<compile_context>
chip_gen: v7x
topology: tpu7x:2x2x1
jax: 0.10.0
libtpu: 0.0.40
codegen_flags: <defaults>
</compile_context>

<pallas_src>
import math
import functools

import jax
import jax.numpy as jnp
import numpy as np
from jax.experimental import pallas as pl
from jax.experimental.pallas import tpu as pltpu


def _edge_attn_kernel(xg_ref, w_qkv_ref, b_qkv_ref, wo_ref, bo_ref,
                      lu_ref, attn_ref, *, num_heads: int, head_dim: int,
                      skip_softmax_max: bool = False):
    bt, T, in_total = xg_ref.shape
    E = num_heads * head_dim
    N = bt * T

    # Flatten (B_TILE, T, .) -> (N, .) so the projection matmul sees N = B_TILE*T rows.
    xg = xg_ref[...].reshape(N, in_total)

    # Fused (Linear + concat + in-proj), Q/K/V stacked: ONE 3E-wide MXU dot per grid step.
    qkv = (jnp.dot(xg, w_qkv_ref[...], preferred_element_type=jnp.float32)
           + b_qkv_ref[...])                                   # (N, 3E), softmax scale in Q
    qkv3 = qkv.reshape(bt, T, 3 * E)

    attn_acc = jnp.zeros((bt, T, T), jnp.float32)
    ctx_heads = []
    for h in range(num_heads):            # static unrolled; num_heads is small
        lo = h * head_dim
        qh = qkv3[:, :, lo:lo + head_dim]                      # (bt, T, Dh), already scaled
        kh = qkv3[:, :, E + lo:E + lo + head_dim]
        vh = qkv3[:, :, 2 * E + lo:2 * E + lo + head_dim]

        s = jnp.einsum('bqd,bkd->bqk', qh, kh,
                       preferred_element_type=jnp.float32)     # (bt, T, T)
        if not skip_softmax_max:
            s = s - jnp.max(s, axis=-1, keepdims=True)
        p = jnp.exp(s)
        l = jnp.sum(p, axis=-1, keepdims=True)
        # EUP approximate reciprocal + Newton-Raphson refinement: full f32 accuracy, and the
        # divide sits in the otherwise-idle EUP slot (refinement is 4 tiny VPU ops on (bt,T,1)).
        inv = pl.reciprocal(l, approx=True)
        inv = inv * (2.0 - l * inv)
        inv = inv * (2.0 - l * inv)
        p = p * inv
        attn_acc = attn_acc + p

        ctx_heads.append(jnp.einsum('bqk,bkd->bqd', p, vh,
                                    preferred_element_type=jnp.float32))  # (bt, T, Dh)

    # Heads are lane-contiguous in the E dim (torch layout), so one wide out-projection dot.
    ctx = jnp.concatenate(ctx_heads, axis=-1).reshape(N, E)
    lu = jnp.dot(ctx, wo_ref[...], preferred_element_type=jnp.float32) + bo_ref[...]
    lu_ref[...] = lu.astype(lu_ref.dtype)                      # (N, E) store, no reshape
    # torch.relu(batch_edge_weight) is the identity on softmax outputs -> omitted.
    attn_ref[...] = (attn_acc * (1.0 / num_heads)).astype(attn_ref.dtype)


def _dual_tensorcore():
    """Best-effort detection of dual-TensorCore chips (v7x-class)."""
    try:
        kind = jax.devices()[0].device_kind.lower()
    except Exception:
        return False
    return ("v7" in kind) or ("7x" in kind)


def _step_vmem_bytes(bt, T, in_total, E, *, buffers=2):
    # per-step tiles in f32 equivalent: [x|g] input, lu output, attn output (T^2 term dominates)
    return buffers * 4 * bt * T * (in_total + E + T)


def _pick_b_tile(B, T, in_total, E, *, dual_tc, vmem_budget_bytes=24 << 20):
    """Largest batch tile that fits the VMEM budget; on dual-TC chips keep >= 2 grid steps."""
    for bt in sorted((d for d in range(1, B + 1) if B % d == 0), reverse=True):
        if dual_tc and B // bt < 2:
            continue
        if _step_vmem_bytes(bt, T, in_total, E) <= vmem_budget_bytes:
            return bt
    return 1


def unimodal_edge_attention_forward(x, g, params, *, num_heads, b_tile=None,
                                    skip_softmax_max=False):
    """x: (B, T, in_dim), g: (B, T, g_dim).  Returns (batch_edge_weight (B,T,T), lu (B,T,E))."""
    B, T, in_dim = x.shape
    g_dim = g.shape[2]
    E = 2 * g_dim
    head_dim = E // num_heads
    in_total = in_dim + g_dim

    wlin, blin, wq, wk, wv, bq, bk, bv, wo, bo = params

    # ---- wrapper-side weight fusion (done once) --------------------------------------------
    scale = 1.0 / math.sqrt(head_dim)
    w_in = jnp.concatenate([wq * scale, wk, wv], axis=1)       # (E, 3E), softmax scale in Q
    b_in = jnp.concatenate([bq * scale, bk, bv], axis=1)       # (1, 3E)
    w_top, w_bot = w_in[:g_dim], w_in[g_dim:]                  # split along x1 = [Linear(x), g]
    # Single stacked projection for the concatenated [x, g] input (Linear fused in):
    w_qkv = jnp.concatenate([wlin @ w_top, w_bot], axis=0)     # (in_dim + g_dim, 3E)
    b_qkv = blin @ w_top + b_in                                # (1, 3E)

    xg = jnp.concatenate([x, g], axis=-1)                      # (B, T, in_dim + g_dim)

    dual_tc = _dual_tensorcore()
    if b_tile is None:
        b_tile = _pick_b_tile(B, T, in_total, E, dual_tc=dual_tc)
    assert B % b_tile == 0, "batch must be divisible by b_tile"
    grid = B // b_tile

    # Explicit VMEM limit only when the estimate exceeds the 32 MiB scoped default
    # (matters on v7x's 64 MiB physical VMEM when b_tile / T are raised for real workloads).
    weight_bytes = 4 * (in_total * 3 * E + 3 * E + E * E + E)
    vmem_est = _step_vmem_bytes(b_tile, T, in_total, E,
                                buffers=(2 if grid > 1 else 1)) + 2 * weight_bytes
    cp_kwargs = dict(dimension_semantics=("parallel",))
    if vmem_est > (32 << 20):
        cp_kwargs["vmem_limit_bytes"] = int(min(vmem_est * 3 // 2, 64 << 20))

    kernel = functools.partial(_edge_attn_kernel, num_heads=num_heads, head_dim=head_dim,
                               skip_softmax_max=skip_softmax_max)

    lu2d, attn = pl.pallas_call(
        kernel,
        out_shape=(
            jax.ShapeDtypeStruct((B * T, E), jnp.float32),     # lu, lane-dense 2D block
            jax.ShapeDtypeStruct((B, T, T), jnp.float32),      # batch_edge_weight
        ),
        grid_spec=pltpu.PrefetchScalarGridSpec(
            num_scalar_prefetch=0,
            grid=(grid,),
            in_specs=[
                pl.BlockSpec((b_tile, T, in_total), lambda i: (i, 0, 0)),     # [x, g]
                pl.BlockSpec((in_total, 3 * E), lambda i: (0, 0)),            # W_qkv (fused)
                pl.BlockSpec((1, 3 * E), lambda i: (0, 0)),                   # b_qkv
                pl.BlockSpec((E, E), lambda i: (0, 0)),                       # Wo
                pl.BlockSpec((1, E), lambda i: (0, 0)),                       # bo
            ],
            out_specs=[
                pl.BlockSpec((b_tile * T, E), lambda i: (i, 0)),
                pl.BlockSpec((b_tile, T, T), lambda i: (i, 0, 0)),
            ],
        ),
        compiler_params=pltpu.CompilerParams(**cp_kwargs),
    )(xg, w_qkv, b_qkv, wo, bo)

    return attn, lu2d.reshape(B, T, E)


def _reference(x, g, params, num_heads):
    """Pure-JAX reference mirroring torch.nn.MultiheadAttention semantics."""
    wlin, blin, wq, wk, wv, bq, bk, bv, wo, bo = params
    B, T, _ = x.shape
    E = wq.shape[0]
    Dh = E // num_heads
    x1 = jnp.concatenate([x @ wlin + blin, g], axis=-1)           # (B,T,E)
    q = (x1 @ wq + bq).reshape(B, T, num_heads, Dh)
    k = (x1 @ wk + bk).reshape(B, T, num_heads, Dh)
    v = (x1 @ wv + bv).reshape(B, T, num_heads, Dh)
    s = jnp.einsum("bqhd,bkhd->bhqk", q, k) / math.sqrt(Dh)
    p = jax.nn.softmax(s, axis=-1)                                # (B,H,T,T)
    ctx = jnp.einsum("bhqk,bkhd->bqhd", p, v).reshape(B, T, E)
    lu = ctx @ wo + bo
    attn = jnp.maximum(p.mean(axis=1), 0.0)
    return attn, lu


if __name__ == "__main__":
    # module hyper-params (small, consistent with the forward)
    B, T, in_dim, g_dim, heads = 4, 8, 16, 16, 4
    E = 2 * g_dim

    key = jax.random.PRNGKey(0)
    ks = jax.random.split(key, 12)

    x = jax.random.normal(ks[0], (B, T, in_dim), jnp.float32)
    g = jax.random.normal(ks[1], (B, T, g_dim), jnp.float32)

    # Deterministic synthetic parameters (shapes from nn.Linear / nn.MultiheadAttention).
    # All weight matrices stored pre-transposed: y = x @ W + b.
    scale = 0.1
    wlin = scale * jax.random.normal(ks[2], (in_dim, g_dim), jnp.float32)
    blin = scale * jax.random.normal(ks[3], (1, g_dim), jnp.float32)
    wq = scale * jax.random.normal(ks[4], (E, E), jnp.float32)
    wk = scale * jax.random.normal(ks[5], (E, E), jnp.float32)
    wv = scale * jax.random.normal(ks[6], (E, E), jnp.float32)
    bq = scale * jax.random.normal(ks[7], (1, E), jnp.float32)
    bk = scale * jax.random.normal(ks[8], (1, E), jnp.float32)
    bv = scale * jax.random.normal(ks[9], (1, E), jnp.float32)
    wo = scale * jax.random.normal(ks[10], (E, E), jnp.float32)
    bo = scale * jax.random.normal(ks[11], (1, E), jnp.float32)

    params = (wlin, blin, wq, wk, wv, bq, bk, bv, wo, bo)

    attn, lu = unimodal_edge_attention_forward(x, g, params, num_heads=heads)
    jax.block_until_ready((attn, lu))

    attn_ref, lu_ref = _reference(x, g, params, heads)
    np.testing.assert_allclose(np.asarray(attn), np.asarray(attn_ref), atol=1e-5, rtol=1e-5)
    np.testing.assert_allclose(np.asarray(lu), np.asarray(lu_ref), atol=1e-5, rtol=1e-5)

    print("KERNEL_OK")
</pallas_src>

<mosaic_0001>
module attributes {stable_mosaic.version = 11 : i64} {
  func.func @_edge_attn_kernel(%arg0: i32, %arg1: memref<4x8x32xf32, #tpu.memory_space<vmem>>, %arg2: memref<32x96xf32, #tpu.memory_space<vmem>>, %arg3: memref<1x96xf32, #tpu.memory_space<vmem>>, %arg4: memref<32x32xf32, #tpu.memory_space<vmem>>, %arg5: memref<1x32xf32, #tpu.memory_space<vmem>>, %arg6: memref<32x32xf32, #tpu.memory_space<vmem>>, %arg7: memref<4x8x8xf32, #tpu.memory_space<vmem>>) attributes {dimension_semantics = [#tpu.dimension_semantics<parallel>], iteration_bounds = array<i64: 1>, scalar_prefetch = 0 : i64, scratch_operands = 0 : i64, tpu.core_type = #tpu.core_type<tc>, window_params = [{transform_indices = @transform_0, window_bounds = array<i64: 4, 8, 32>}, {pipeline_mode = #tpu.pipeline_mode<synchronous>, transform_indices = @transform_1, window_bounds = array<i64: 32, 96>}, {pipeline_mode = #tpu.pipeline_mode<synchronous>, transform_indices = @transform_2, window_bounds = array<i64: 1, 96>}, {pipeline_mode = #tpu.pipeline_mode<synchronous>, transform_indices = @transform_3, window_bounds = array<i64: 32, 32>}, {pipeline_mode = #tpu.pipeline_mode<synchronous>, transform_indices = @transform_4, window_bounds = array<i64: 1, 32>}, {transform_indices = @transform_5, window_bounds = array<i64: 32, 32>}, {transform_indices = @transform_6, window_bounds = array<i64: 4, 8, 8>}]} {
    %c0 = arith.constant 0 : index
    %c0_0 = arith.constant 0 : index
    %c0_1 = arith.constant 0 : index
    %0 = vector.load %arg1[%c0, %c0_0, %c0_1] : memref<4x8x32xf32, #tpu.memory_space<vmem>>, vector<4x8x32xf32>
    %1 = vector.shape_cast %0 : vector<4x8x32xf32> to vector<32x32xf32>
    %c0_2 = arith.constant 0 : index
    %c0_3 = arith.constant 0 : index
    %2 = vector.load %arg2[%c0_2, %c0_3] : memref<32x96xf32, #tpu.memory_space<vmem>>, vector<32x96xf32>
    %cst = arith.constant dense<0.000000e+00> : vector<32x96xf32>
    %3 = tpu.matmul %1, %2, %cst {dimension_numbers = #tpu.dot_dimension_numbers<[1], [0], [0], [1], [0, 0, 1, 1], [], []>} : vector<32x32xf32>, vector<32x96xf32>, vector<32x96xf32> -> vector<32x96xf32>
    %c0_4 = arith.constant 0 : index
    %c0_5 = arith.constant 0 : index
    %4 = vector.load %arg3[%c0_4, %c0_5] : memref<1x96xf32, #tpu.memory_space<vmem>>, vector<1x96xf32>
    %5 = vector.broadcast %4 : vector<1x96xf32> to vector<32x96xf32>
    %6 = arith.addf %3, %5 : vector<32x96xf32>
    %7 = vector.shape_cast %6 : vector<32x96xf32> to vector<4x8x96xf32>
    %cst_6 = arith.constant 0.000000e+00 : f32
    %8 = vector.broadcast %cst_6 : f32 to vector<4x8x8xf32>
    %9 = vector.extract_strided_slice %7 {offsets = [0, 0, 0], sizes = [4, 8, 8], strides = [1, 1, 1]} : vector<4x8x96xf32> to vector<4x8x8xf32>
    %10 = vector.extract_strided_slice %7 {offsets = [0, 0, 32], sizes = [4, 8, 8], strides = [1, 1, 1]} : vector<4x8x96xf32> to vector<4x8x8xf32>
    %11 = vector.extract_strided_slice %7 {offsets = [0, 0, 64], sizes = [4, 8, 8], strides = [1, 1, 1]} : vector<4x8x96xf32> to vector<4x8x8xf32>
    "tpu.trace_start"() <{level = 10 : i32, message = "bqd,bkd->bqk"}> : () -> ()
    %cst_7 = arith.constant dense<0.000000e+00> : vector<4x8x8xf32>
    %12 = tpu.matmul %9, %10, %cst_7 {dimension_numbers = #tpu.dot_dimension_numbers<[2], [2], [1], [1], [0, 0, 0, 1, 1, 1], [0], [0]>} : vector<4x8x8xf32>, vector<4x8x8xf32>, vector<4x8x8xf32> -> vector<4x8x8xf32>
    "tpu.trace_stop"() : () -> ()
    %cst_8 = arith.constant dense<0xFF800000> : vector<4x8xf32>
    %13 = vector.multi_reduction <maximumf>, %12, %cst_8 [2] : vector<4x8x8xf32> to vector<4x8xf32>
    %14 = vector.shape_cast %13 : vector<4x8xf32> to vector<4x8x1xf32>
    %15 = vector.broadcast %14 : vector<4x8x1xf32> to vector<4x8x8xf32>
    %16 = arith.subf %12, %15 : vector<4x8x8xf32>
    %17 = math.exp %16 : vector<4x8x8xf32>
    %cst_9 = arith.constant dense<0.000000e+00> : vector<4x8xf32>
    %18 = vector.multi_reduction <add>, %17, %cst_9 [2] : vector<4x8x8xf32> to vector<4x8xf32>
    %19 = vector.shape_cast %18 : vector<4x8xf32> to vector<4x8x1xf32>
    %20 = tpu.reciprocal %19 {approx = true} : vector<4x8x1xf32> -> vector<4x8x1xf32>
    %21 = arith.mulf %19, %20 : vector<4x8x1xf32>
    %cst_10 = arith.constant 2.000000e+00 : f32
    %22 = vector.broadcast %cst_10 : f32 to vector<4x8x1xf32>
    %23 = arith.subf %22, %21 : vector<4x8x1xf32>
    %24 = arith.mulf %20, %23 : vector<4x8x1xf32>
    %25 = arith.mulf %19, %24 : vector<4x8x1xf32>
    %cst_11 = arith.constant 2.000000e+00 : f32
    %26 = vector.broadcast %cst_11 : f32 to vector<4x8x1xf32>
    %27 = arith.subf %26, %25 : vector<4x8x1xf32>
    %28 = arith.mulf %24, %27 : vector<4x8x1xf32>
    %29 = vector.broadcast %28 : vector<4x8x1xf32> to vector<4x8x8xf32>
    %30 = arith.mulf %17, %29 : vector<4x8x8xf32>
    %31 = arith.addf %8, %30 : vector<4x8x8xf32>
    "tpu.trace_start"() <{level = 10 : i32, message = "bqk,bkd->bqd"}> : () -> ()
    %cst_12 = arith.constant dense<0.000000e+00> : vector<4x8x8xf32>
    %32 = tpu.matmul %30, %11, %cst_12 {dimension_numbers = #tpu.dot_dimension_numbers<[2], [1], [1], [2], [0, 0, 0, 1, 1, 2], [0], [0]>} : vector<4x8x8xf32>, vector<4x8x8xf32>, vector<4x8x8xf32> -> vector<4x8x8xf32>
    "tpu.trace_stop"() : () -> ()
    %33 = vector.extract_strided_slice %7 {offsets = [0, 0, 8], sizes = [4, 8, 8], strides = [1, 1, 1]} : vector<4x8x96xf32> to vector<4x8x8xf32>
    %34 = vector.extract_strided_slice %7 {offsets = [0, 0, 40], sizes = [4, 8, 8], strides = [1, 1, 1]} : vector<4x8x96xf32> to vector<4x8x8xf32>
    %35 = vector.extract_strided_slice %7 {offsets = [0, 0, 72], sizes = [4, 8, 8], strides = [1, 1, 1]} : vector<4x8x96xf32> to vector<4x8x8xf32>
    "tpu.trace_start"() <{level = 10 : i32, message = "bqd,bkd->bqk"}> : () -> ()
    %cst_13 = arith.constant dense<0.000000e+00> : vector<4x8x8xf32>
    %36 = tpu.matmul %33, %34, %cst_13 {dimension_numbers = #tpu.dot_dimension_numbers<[2], [2], [1], [1], [0, 0, 0, 1, 1, 1], [0], [0]>} : vector<4x8x8xf32>, vector<4x8x8xf32>, vector<4x8x8xf32> -> vector<4x8x8xf32>
    "tpu.trace_stop"() : () -> ()
    %cst_14 = arith.constant dense<0xFF800000> : vector<4x8xf32>
    %37 = vector.multi_reduction <maximumf>, %36, %cst_14 [2] : vector<4x8x8xf32> to vector<4x8xf32>
    %38 = vector.shape_cast %37 : vector<4x8xf32> to vector<4x8x1xf32>
    %39 = vector.broadcast %38 : vector<4x8x1xf32> to vector<4x8x8xf32>
    %40 = arith.subf %36, %39 : vector<4x8x8xf32>
    %41 = math.exp %40 : vector<4x8x8xf32>
    %cst_15 = arith.constant dense<0.000000e+00> : vector<4x8xf32>
    %42 = vector.multi_reduction <add>, %41, %cst_15 [2] : vector<4x8x8xf32> to vector<4x8xf32>
    %43 = vector.shape_cast %42 : vector<4x8xf32> to vector<4x8x1xf32>
    %44 = tpu.reciprocal %43 {approx = true} : vector<4x8x1xf32> -> vector<4x8x1xf32>
    %45 = arith.mulf %43, %44 : vector<4x8x1xf32>
    %cst_16 = arith.constant 2.000000e+00 : f32
    %46 = vector.broadcast %cst_16 : f32 to vector<4x8x1xf32>
    %47 = arith.subf %46, %45 : vector<4x8x1xf32>
    %48 = arith.mulf %44, %47 : vector<4x8x1xf32>
    %49 = arith.mulf %43, %48 : vector<4x8x1xf32>
    %cst_17 = arith.constant 2.000000e+00 : f32
    %50 = vector.broadcast %cst_17 : f32 to vector<4x8x1xf32>
    %51 = arith.subf %50, %49 : vector<4x8x1xf32>
    %52 = arith.mulf %48, %51 : vector<4x8x1xf32>
    %53 = vector.broadcast %52 : vector<4x8x1xf32> to vector<4x8x8xf32>
    %54 = arith.mulf %41, %53 : vector<4x8x8xf32>
    %55 = arith.addf %31, %54 : vector<4x8x8xf32>
    "tpu.trace_start"() <{level = 10 : i32, message = "bqk,bkd->bqd"}> : () -> ()
    %cst_18 = arith.constant dense<0.000000e+00> : vector<4x8x8xf32>
    %56 = tpu.matmul %54, %35, %cst_18 {dimension_numbers = #tpu.dot_dimension_numbers<[2], [1], [1], [2], [0, 0, 0, 1, 1, 2], [0], [0]>} : vector<4x8x8xf32>, vector<4x8x8xf32>, vector<4x8x8xf32> -> vector<4x8x8xf32>
    "tpu.trace_stop"() : () -> ()
    %57 = vector.extract_strided_slice %7 {offsets = [0, 0, 16], sizes = [4, 8, 8], strides = [1, 1, 1]} : vector<4x8x96xf32> to vector<4x8x8xf32>
    %58 = vector.extract_strided_slice %7 {offsets = [0, 0, 48], sizes = [4, 8, 8], strides = [1, 1, 1]} : vector<4x8x96xf32> to vector<4x8x8xf32>
    %59 = vector.extract_strided_slice %7 {offsets = [0, 0, 80], sizes = [4, 8, 8], strides = [1, 1, 1]} : vector<4x8x96xf32> to vector<4x8x8xf32>
    "tpu.trace_start"() <{level = 10 : i32, message = "bqd,bkd->bqk"}> : () -> ()
    %cst_19 = arith.constant dense<0.000000e+00> : vector<4x8x8xf32>
    %60 = tpu.matmul %57, %58, %cst_19 {dimension_numbers = #tpu.dot_dimension_numbers<[2], [2], [1], [1], [0, 0, 0, 1, 1, 1], [0], [0]>} : vector<4x8x8xf32>, vector<4x8x8xf32>, vector<4x8x8xf32> -> vector<4x8x8xf32>
    "tpu.trace_stop"() : () -> ()
    %cst_20 = arith.constant dense<0xFF800000> : vector<4x8xf32>
    %61 = vector.multi_reduction <maximumf>, %60, %cst_20 [2] : vector<4x8x8xf32> to vector<4x8xf32>
    %62 = vector.shape_cast %61 : vector<4x8xf32> to vector<4x8x1xf32>
    %63 = vector.broadcast %62 : vector<4x8x1xf32> to vector<4x8x8xf32>
    %64 = arith.subf %60, %63 : vector<4x8x8xf32>
    %65 = math.exp %64 : vector<4x8x8xf32>
    %cst_21 = arith.constant dense<0.000000e+00> : vector<4x8xf32>
    %66 = vector.multi_reduction <add>, %65, %cst_21 [2] : vector<4x8x8xf32> to vector<4x8xf32>
    %67 = vector.shape_cast %66 : vector<4x8xf32> to vector<4x8x1xf32>
    %68 = tpu.reciprocal %67 {approx = true} : vector<4x8x1xf32> -> vector<4x8x1xf32>
    %69 = arith.mulf %67, %68 : vector<4x8x1xf32>
    %cst_22 = arith.constant 2.000000e+00 : f32
    %70 = vector.broadcast %cst_22 : f32 to vector<4x8x1xf32>
    %71 = arith.subf %70, %69 : vector<4x8x1xf32>
    %72 = arith.mulf %68, %71 : vector<4x8x1xf32>
    %73 = arith.mulf %67, %72 : vector<4x8x1xf32>
    %cst_23 = arith.constant 2.000000e+00 : f32
    %74 = vector.broadcast %cst_23 : f32 to vector<4x8x1xf32>
    %75 = arith.subf %74, %73 : vector<4x8x1xf32>
    %76 = arith.mulf %72, %75 : vector<4x8x1xf32>
    %77 = vector.broadcast %76 : vector<4x8x1xf32> to vector<4x8x8xf32>
    %78 = arith.mulf %65, %77 : vector<4x8x8xf32>
    %79 = arith.addf %55, %78 : vector<4x8x8xf32>
    "tpu.trace_start"() <{level = 10 : i32, message = "bqk,bkd->bqd"}> : () -> ()
    %cst_24 = arith.constant dense<0.000000e+00> : vector<4x8x8xf32>
    %80 = tpu.matmul %78, %59, %cst_24 {dimension_numbers = #tpu.dot_dimension_numbers<[2], [1], [1], [2], [0, 0, 0, 1, 1, 2], [0], [0]>} : vector<4x8x8xf32>, vector<4x8x8xf32>, vector<4x8x8xf32> -> vector<4x8x8xf32>
    "tpu.trace_stop"() : () -> ()
    %81 = vector.extract_strided_slice %7 {offsets = [0, 0, 24], sizes = [4, 8, 8], strides = [1, 1, 1]} : vector<4x8x96xf32> to vector<4x8x8xf32>
    %82 = vector.extract_strided_slice %7 {offsets = [0, 0, 56], sizes = [4, 8, 8], strides = [1, 1, 1]} : vector<4x8x96xf32> to vector<4x8x8xf32>
    %83 = vector.extract_strided_slice %7 {offsets = [0, 0, 88], sizes = [4, 8, 8], strides = [1, 1, 1]} : vector<4x8x96xf32> to vector<4x8x8xf32>
    "tpu.trace_start"() <{level = 10 : i32, message = "bqd,bkd->bqk"}> : () -> ()
    %cst_25 = arith.constant dense<0.000000e+00> : vector<4x8x8xf32>
    %84 = tpu.matmul %81, %82, %cst_25 {dimension_numbers = #tpu.dot_dimension_numbers<[2], [2], [1], [1], [0, 0, 0, 1, 1, 1], [0], [0]>} : vector<4x8x8xf32>, vector<4x8x8xf32>, vector<4x8x8xf32> -> vector<4x8x8xf32>
    "tpu.trace_stop"() : () -> ()
    %cst_26 = arith.constant dense<0xFF800000> : vector<4x8xf32>
    %85 = vector.multi_reduction <maximumf>, %84, %cst_26 [2] : vector<4x8x8xf32> to vector<4x8xf32>
    %86 = vector.shape_cast %85 : vector<4x8xf32> to vector<4x8x1xf32>
    %87 = vector.broadcast %86 : vector<4x8x1xf32> to vector<4x8x8xf32>
    %88 = arith.subf %84, %87 : vector<4x8x8xf32>
    %89 = math.exp %88 : vector<4x8x8xf32>
    %cst_27 = arith.constant dense<0.000000e+00> : vector<4x8xf32>
    %90 = vector.multi_reduction <add>, %89, %cst_27 [2] : vector<4x8x8xf32> to vector<4x8xf32>
    %91 = vector.shape_cast %90 : vector<4x8xf32> to vector<4x8x1xf32>
    %92 = tpu.reciprocal %91 {approx = true} : vector<4x8x1xf32> -> vector<4x8x1xf32>
    %93 = arith.mulf %91, %92 : vector<4x8x1xf32>
    %cst_28 = arith.constant 2.000000e+00 : f32
    %94 = vector.broadcast %cst_28 : f32 to vector<4x8x1xf32>
    %95 = arith.subf %94, %93 : vector<4x8x1xf32>
    %96 = arith.mulf %92, %95 : vector<4x8x1xf32>
    %97 = arith.mulf %91, %96 : vector<4x8x1xf32>
    %cst_29 = arith.constant 2.000000e+00 : f32
    %98 = vector.broadcast %cst_29 : f32 to vector<4x8x1xf32>
    %99 = arith.subf %98, %97 : vector<4x8x1xf32>
    %100 = arith.mulf %96, %99 : vector<4x8x1xf32>
    %101 = vector.broadcast %100 : vector<4x8x1xf32> to vector<4x8x8xf32>
    %102 = arith.mulf %89, %101 : vector<4x8x8xf32>
    %103 = arith.addf %79, %102 : vector<4x8x8xf32>
    "tpu.trace_start"() <{level = 10 : i32, message = "bqk,bkd->bqd"}> : () -> ()
    %cst_30 = arith.constant dense<0.000000e+00> : vector<4x8x8xf32>
    %104 = tpu.matmul %102, %83, %cst_30 {dimension_numbers = #tpu.dot_dimension_numbers<[2], [1], [1], [2], [0, 0, 0, 1, 1, 2], [0], [0]>} : vector<4x8x8xf32>, vector<4x8x8xf32>, vector<4x8x8xf32> -> vector<4x8x8xf32>
    "tpu.trace_stop"() : () -> ()
    %105 = tpu.concatenate %32, %56, %80, %104 in 2 : vector<4x8x8xf32>, vector<4x8x8xf32>, vector<4x8x8xf32>, vector<4x8x8xf32> -> vector<4x8x32xf32>
    %106 = vector.shape_cast %105 : vector<4x8x32xf32> to vector<32x32xf32>
    %c0_31 = arith.constant 0 : index
    %c0_32 = arith.constant 0 : index
    %107 = vector.load %arg4[%c0_31, %c0_32] : memref<32x32xf32, #tpu.memory_space<vmem>>, vector<32x32xf32>
    %cst_33 = arith.constant dense<0.000000e+00> : vector<32x32xf32>
    %108 = tpu.matmul %106, %107, %cst_33 {dimension_numbers = #tpu.dot_dimension_numbers<[1], [0], [0], [1], [0, 0, 1, 1], [], []>} : vector<32x32xf32>, vector<32x32xf32>, vector<32x32xf32> -> vector<32x32xf32>
    %c0_34 = arith.constant 0 : index
    %c0_35 = arith.constant 0 : index
    %109 = vector.load %arg5[%c0_34, %c0_35] : memref<1x32xf32, #tpu.memory_space<vmem>>, vector<1x32xf32>
    %110 = vector.broadcast %109 : vector<1x32xf32> to vector<32x32xf32>
    %111 = arith.addf %108, %110 : vector<32x32xf32>
    %c0_36 = arith.constant 0 : index
    %c0_37 = arith.constant 0 : index
    %112 = vector.load %arg6[%c0_36, %c0_37] : memref<32x32xf32, #tpu.memory_space<vmem>>, vector<32x32xf32>
    tpu.vector_store %arg6[%c0_36, %c0_37], %111 {strides = array<i32>} : memref<32x32xf32, #tpu.memory_space<vmem>>, vector<32x32xf32>,
    %cst_38 = arith.constant 2.500000e-01 : f32
    %113 = vector.broadcast %cst_38 : f32 to vector<4x8x8xf32>
    %114 = arith.mulf %103, %113 : vector<4x8x8xf32>
    %c0_39 = arith.constant 0 : index
    %c0_40 = arith.constant 0 : index
    %c0_41 = arith.constant 0 : index
    %115 = vector.load %arg7[%c0_39, %c0_40, %c0_41] : memref<4x8x8xf32, #tpu.memory_space<vmem>>, vector<4x8x8xf32>
    tpu.vector_store %arg7[%c0_39, %c0_40, %c0_41], %114 {strides = array<i32>} : memref<4x8x8xf32, #tpu.memory_space<vmem>>, vector<4x8x8xf32>,
    return
  }
  func.func @transform_0(%arg0: i32) -> (i32, i32, i32) {
    %c0_i32 = arith.constant 0 : i32
    %c0_i32_0 = arith.constant 0 : i32
    %c0_i32_1 = arith.constant 0 : i32
    return %arg0, %c0_i32, %c0_i32_0 : i32, i32, i32
  }
  func.func @transform_1(%arg0: i32) -> (i32, i32) {
    %c0_i32 = arith.constant 0 : i32
    %c0_i32_0 = arith.constant 0 : i32
    %c0_i32_1 = arith.constant 0 : i32
    return %c0_i32, %c0_i32_0 : i32, i32
  }
  func.func @transform_2(%arg0: i32) -> (i32, i32) {
    %c0_i32 = arith.constant 0 : i32
    %c0_i32_0 = arith.constant 0 : i32
    %c0_i32_1 = arith.constant 0 : i32
    return %c0_i32, %c0_i32_0 : i32, i32
  }
  func.func @transform_3(%arg0: i32) -> (i32, i32) {
    %c0_i32 = arith.constant 0 : i32
    %c0_i32_0 = arith.constant 0 : i32
    %c0_i32_1 = arith.constant 0 : i32
    return %c0_i32, %c0_i32_0 : i32, i32
  }
  func.func @transform_4(%arg0: i32) -> (i32, i32) {
    %c0_i32 = arith.constant 0 : i32
    %c0_i32_0 = arith.constant 0 : i32
    %c0_i32_1 = arith.constant 0 : i32
    return %c0_i32, %c0_i32_0 : i32, i32
  }
  func.func @transform_5(%arg0: i32) -> (i32, i32) {
    %c0_i32 = arith.constant 0 : i32
    %c0_i32_0 = arith.constant 0 : i32
    return %arg0, %c0_i32 : i32, i32
  }
  func.func @transform_6(%arg0: i32) -> (i32, i32, i32) {
    %c0_i32 = arith.constant 0 : i32
    %c0_i32_0 = arith.constant 0 : i32
    %c0_i32_1 = arith.constant 0 : i32
    return %arg0, %c0_i32, %c0_i32_0 : i32, i32, i32
  }
}

</mosaic_0001>

<bundles_post_ra>
// kernel: tpu_custom_call.1
= control target key start
LH: loop header
LB: loop body
LE: loop exit
PB: predicated region body
PF: predicated region fallthrough
CT: control target
= control target key end

     0   :  { %12 = vsyncpa [#allocation3], 0  ;;  %s4214_s0 = inlined_call_operand.hbm [shape: f32[4,8,32], index: 0, kind: input, shape index: {}]   ;;  %s4215_s1 = inlined_call_operand.hbm [shape: f32[32,96], index: 1, kind: input, shape index: {}]   ;;  %s4216_s2 = inlined_call_operand.vmem [shape: f32[1,96], index: 2, kind: input, shape index: {}]   ;;  %s4217_s3 = inlined_call_operand.hbm [shape: f32[32,32], index: 3, kind: input, shape index: {}]   ;;  %s4218_s4 = inlined_call_operand.vmem [shape: f32[1,32], index: 4, kind: input, shape index: {}]   ;;  %s4219_s5 = inlined_call_operand.hbm [shape: f32[32,32], index: 5, kind: output, shape index: {0}]   ;;  %s4220_s6 = inlined_call_operand.hbm [shape: f32[4,8,8], index: 6, kind: output, shape index: {1}]  }
   0x1   :  { %13 = vsyncpa [#allocation6], 0 }
   0x2   :  { %14 = vsyncpa [#allocation4], 0 }
   0x3   :  { %15 = vsyncpa [#allocation10], 0  ;;  %s3689_s21 = smov [#allocation5]   ;;  %s3690_s23 = smov [#allocation2]  }
   0x4   :  { %s33_s22 = sshll.u32 %s3689_s21, 4  ;;  %s21_s24 = sshll.u32 %s3690_s23, 4  ;;  %s34_s22 = int_to_ptr.vmem [resolvable:$true] %s33_s22  ;;  %s3746_s24 = int_to_ptr.vmem [resolvable:$true] %s21_s24 }
   0x5   :  { %s3571_s27 = scalar_lea.hbm %s4215_s1, 512 }
   0x6   :  { %p3572_p0 = scmp.ne.s32.totalorder %s4215_s1, %s3571_s27  ;;  %p3575_p1 = scmp.lt.u32.totalorder %s3571_s27, %s4215_s1 }
   0x8   :  { %p3577_p2 = pnand %p3575_p1, %p3572_p0 }
   0xa   :  { %3580 = shalt.err (!%p3577_p2)
}
   0xb   :  { %s3581_s8 = scalar_lea.vmem %s34_s22, 512  ;;  %p3586_p4 = scmp.lt.s32.totalorder %s34_s22, %s34_s22 }
   0xc   :  { %p3582_p3 = scmp.ne.s32.totalorder %s34_s22, %s3581_s8  ;;  %p3587_p5 = scmp.lt.s32.totalorder %s3581_s8, %s3581_s8 }
   0xe   :  { %p3588_p6 = por %p3587_p5, %p3586_p4 }
  0x10   :  { %p3589_p7 = pnand %p3588_p6, %p3582_p3 }
  0x12   :  { %3592 = shalt.err (!%p3589_p7)
}
  0x13   :  { %s3691_s9 = smov 128   ;;  %s3692_s10 = smov 8  }
  0x14   :  { %39 = dma.hbm_to_vmem [thread:$0]  %s4215_s1, 512, %s34_s22, [#allocation6], %s3691_s9, %s3691_s9, %s3692_s10  }
  0x15   :  { %s3593_s15 = scalar_lea.hbm %s4214_s0, 512 }
  0x16   :  { %p3594_p8 = scmp.ne.s32.totalorder %s4214_s0, %s3593_s15  ;;  %p3597_p9 = scmp.lt.u32.totalorder %s3593_s15, %s4214_s0 }
  0x18   :  { %p3599_p10 = pnand %p3597_p9, %p3594_p8 }
  0x1a   :  { %3602 = shalt.err (!%p3599_p10)
}
  0x1b   :  { %s3603_s20 = scalar_lea.vmem %s3746_s24, 512  ;;  %p3608_p12 = scmp.lt.s32.totalorder %s3746_s24, %s3746_s24 }
  0x1c   :  { %p3604_p11 = scmp.ne.s32.totalorder %s3746_s24, %s3603_s20  ;;  %p3609_p13 = scmp.lt.s32.totalorder %s3603_s20, %s3603_s20 }
  0x1e   :  { %p3610_p0 = por %p3609_p13, %p3608_p12 }
  0x20   :  { %p3611_p1 = pnand %p3610_p0, %p3604_p11 }
  0x22   :  { %3614 = shalt.err (!%p3611_p1)
}
  0x23   :  { %27 = dma.hbm_to_vmem [thread:$0]  %s4214_s0, 512, %s3746_s24, [#allocation3], %s3691_s9, %s3691_s9, %s3692_s10  }
  0x24   :  { %s3693_s22 = smov [#allocation7]   ;;  %s3615_s27 = scalar_lea.hbm %s4217_s3, 512 }
  0x25   :  { %s47_s23 = sshll.u32 %s3693_s22, 4  ;;  %p3616_p2 = scmp.ne.s32.totalorder %s4217_s3, %s3615_s27  ;;  %s48_s23 = int_to_ptr.vmem [resolvable:$true] %s47_s23 }
  0x26   :  { %p3619_p3 = scmp.lt.u32.totalorder %s3615_s27, %s4217_s3 }
  0x28   :  { %p3621_p4 = pnand %p3619_p3, %p3616_p2 }
  0x2a   :  { %3624 = shalt.err (!%p3621_p4)
}
  0x2b   :  { %s3625_s8 = scalar_lea.vmem %s48_s23, 512  ;;  %p3630_p6 = scmp.lt.s32.totalorder %s48_s23, %s48_s23 }
  0x2c   :  { %p3626_p5 = scmp.ne.s32.totalorder %s48_s23, %s3625_s8  ;;  %p3631_p7 = scmp.lt.s32.totalorder %s3625_s8, %s3625_s8 }
  0x2e   :  { %p3632_p8 = por %p3631_p7, %p3630_p6 }
  0x30   :  { %p3633_p9 = pnand %p3632_p8, %p3626_p5 }
  0x32   :  { %3636 = shalt.err (!%p3633_p9)
}
  0x33   :  { %53 = dma.hbm_to_vmem [thread:$0]  %s4217_s3, 512, %s48_s23, [#allocation6], %s3691_s9, %s3691_s9, %s3692_s10  }
  0x34   :  { %3681 = dma.done.wait [#allocation3], 512  }
  0x35   :  { %3682 = vsyncadd [#allocation3], 4294966784 }
  0x36   :  { %3683 = dma.done.wait [#allocation6], 1024  }
  0x37   :  { %3684 = vsyncadd [#allocation6], 4294966272  ;;  %vm80_vm0 = vcmask 261120   ;;  %v69_v0 = vld [vmem:[#allocation5] sm:$0xff]  ;;  %v70_v1 = vld [vmem:[#allocation5 + $0x8] sm:$0xff]  ;;  %v3694_v10 = vmov 0.0  }
  0x38   :  { %v71_v2 = vld [vmem:[#allocation5 + $0x10] sm:$0xff]  ;;  %v3469_v3 = vpack.c.bf16 %v70_v1, %v69_v0  ;;  %v72_v4 = vld [vmem:[#allocation5 + $0x18] sm:$0xff]  ;;  %v65_v5 = vld [vmem:[#allocation2] sm:$0xff]  ;;  %3300 = vmatprep.subr.mxu1 %v3694_v10  ;;  %vm3695_vm1 = vmmov 0   ;;  %s3696_s12 = smov 96   ;;  %vm181_vm2 = vcmask 64512  }
  0x39   :  { %v3473_v6 = vpack.c.bf16 %v72_v4, %v71_v2  ;;  %3289 = vmatprep.mubr.msk.f32.mxu0 %vm80_vm0, %v65_v5  ;;  %v66_v7 = vld [vmem:[#allocation2 + $0x8] sm:$0xff]  ;;  %v67_v8 = vld [vmem:[#allocation2 + $0x10] sm:$0xff]  ;;  %v68_v9 = vld [vmem:[#allocation2 + $0x18] sm:$0xff]  ;;  %3302 = vmatprep.mubr.msk.f32.mxu1 %vm3695_vm1, %v3694_v10  ;;  %s3698_s13 = smov 88   ;;  %s3699_s14 = smov 120   ;;  %vm2979_vm3 = vcmask 130048  }
  0x3a   :  { %3470 = vmatprep.subr.bf16.mxu0 %v3469_v3  ;;  %v3143_v11 = vld [vmem:[%s4216_s2] ss:$0 sm:$0xff]  ;;  %s3697_s2 = smov 64   ;;  %s3700_s15 = smov 56   ;;  %vm2984_vm4 = vcmask 195584  }
  0x3b   :  { %3472 = vmatpush3.bf16.msra.mxu0 %v3469_v3  ;;  %s3701_s16 = smov 80   ;;  %s3702_s17 = smov 112  }
  0x3c   :  { %3474 = vmatprep.subr.bf16.mxu0 %v3473_v6  ;;  %s3703_s18 = smov 48   ;;  %s3704_s19 = smov 72  }
  0x3d   :  { %s3705_s20 = smov 104   ;;  %s3706_s1 = smov 40  }
  0x3e   :  { %s3707_s21 = smov 16   ;;  %s3708_s22 = smov 24  }
  0x3f   :  { %3476 = vmatpush3.bf16.msra.mxu0 %v3473_v6  ;;  %s3709_s23 = smov [#allocation9]  }
  0x40   :  { %3295 = vmatprep.subr.mxu0 %v3694_v10  ;;  %s3126_s25 = sshll.u32 %s3709_s23, 4  ;;  %s3127_s25 = int_to_ptr.vmem [resolvable:$true] %s3126_s25 }
  0x41   :  { %s3637_s26 = scalar_lea.vmem %s3127_s25, 512  ;;  %p3642_p11 = scmp.lt.s32.totalorder %s3127_s25, %s3127_s25 }
  0x42   :  { %3290 = vmatmul.mubr.msk.f32.vlgmr.msra.gmra.mrb[0].mxu0 %vm80_vm0, %v66_v7  ;;  %p3638_p10 = scmp.ne.s32.totalorder %s3127_s25, %s3637_s26  ;;  %p3643_p12 = scmp.lt.s32.totalorder %s3637_s26, %s3637_s26 }
  0x43   :  { %3292 = vmatprep.mubr.msk.f32.mxu0 %vm80_vm0, %v67_v8 }
  0x44   :  { %p3644_p13 = por %p3643_p12, %p3642_p11 }
  0x46   :  { %3293 = vmatmul.mubr.msk.f32.gmra.mrb[2].mxu0 %vm80_vm0, %v68_v9  ;;  %p3645_p0 = pnand %p3644_p13, %p3638_p10 }
  0x47   :  { %3297 = vmatprep.mubr.msk.f32.mxu0 %vm3695_vm1, %v3694_v10 }
 0x115   :  { %v3291_v12 = vpop.f32.mrb[0].mxu0 }
 0x116   :  { %v159_v13 = vpop.f32.mrb[1].mxu0  ;;  %v3814_v17 = vadd.f32 %v3291_v12, %v3143_v11 }
 0x117   :  { %v3811_v14 = vadd.f32 %v3143_v11, %v159_v13 }
 0x119   :  { %v3294_v15 = vpop.f32.mrb[2].mxu0  ;;  %179 = vrot.lane.b32.xlu0 %v3811_v14, %s3696_s12 }
 0x11a   :  { %v169_v16 = vpop.f32.mrb[3].mxu0  ;;  %v3818_v19 = vadd.f32 %v3294_v15, %v3143_v11 }
 0x11b   :  { %v3816_v18 = vadd.f32 %v3143_v11, %v169_v16 }
 0x11d   :  { %334 = vrot.lane.b32.xlu1 %v3816_v18, %s3696_s12  ;;  %257 = vrot.lane.b32.xlu0 %v3814_v17, %s3696_s12 }
 0x121   :  { %411 = vrot.lane.b32.xlu1 %v3818_v19, %s3696_s12 }
 0x18b   :  { %v180_v20 = vpop.permute.xlu0 %179 }
 0x18c   :  { %3296 = vmatpush3.xpose.msk.msra.mxu0 %vm181_vm2, %v180_v20 }
 0x18d   :  { %3310 = vmatprep.subr.mxu0 %v3694_v10 }
 0x18f   :  { %v335_v21 = vpop.permute.xlu1 %334  ;;  %3298 = vmatmul.mubr.msk.f32.vlgmr.msra.gmra.mrb[4].mxu0 %vm181_vm2, %v3811_v14  ;;  %v258_v22 = vpop.permute.xlu0 %257 }
 0x190   :  { %3301 = vmatpush3.xpose.msk.msra.mxu1 %vm181_vm2, %v258_v22  ;;  %3312 = vmatprep.mubr.msk.f32.mxu0 %vm3695_vm1, %v3694_v10 }
 0x191   :  { %3305 = vmatprep.subr.mxu1 %v3694_v10 }
 0x193   :  { %v412_v23 = vpop.permute.xlu1 %411  ;;  %3303 = vmatmul.mubr.msk.f32.vlgmr.msra.gmra.mrb[0].mxu1 %vm181_vm2, %v3814_v17 }
 0x194   :  { %3306 = vmatpush3.xpose.msk.msra.mxu1 %vm181_vm2, %v335_v21  ;;  %3311 = vmatpush3.xpose.msk.msra.mxu0 %vm181_vm2, %v412_v23 }
 0x195   :  { %3307 = vmatprep.mubr.msk.f32.mxu1 %vm3695_vm1, %v3694_v10  ;;  %3315 = vmatprep.subr.mxu1 %v3694_v10 }
 0x196   :  { %3320 = vmatprep.subr.mxu0 %v3694_v10 }
 0x197   :  { %3308 = vmatmul.mubr.msk.f32.vlgmr.msra.gmra.mrb[2].mxu1 %vm181_vm2, %v3816_v18  ;;  %3313 = vmatmul.mubr.msk.f32.vlgmr.msra.gmra.mrb[6].mxu0 %vm181_vm2, %v3818_v19 }
 0x198   :  { %3317 = vmatprep.mubr.msk.f32.mxu1 %vm3695_vm1, %v3694_v10  ;;  %3322 = vmatprep.mubr.msk.f32.mxu0 %vm3695_vm1, %v3694_v10 }
 0x262   :  { %v252_v24 = vpop.f32.mrb[4].mxu0 }
 0x263   :  { %v3299_v25 = vpop.f32.mrb[5].mxu0  ;;  %v487_v26 = vsel %vm181_vm2, %v252_v24, -inf }
 0x264   :  { %488 = vmax.xlane.f32.xlu0 %v487_v26 }
 0x266   :  { %v329_v27 = vpop.f32.mrb[0].mxu1 }
 0x267   :  { %v3304_v28 = vpop.f32.mrb[1].mxu1  ;;  %v490_v29 = vsel %vm181_vm2, %v329_v27, -inf }
 0x268   :  { %491 = vmax.xlane.f32.xlu1 %v490_v29 }
 0x26a   :  { %v406_v30 = vpop.f32.mrb[2].mxu1  ;;  %v483_v31 = vpop.f32.mrb[6].mxu0 }
 0x26b   :  { %v3309_v32 = vpop.f32.mrb[3].mxu1  ;;  %v3314_v33 = vpop.f32.mrb[7].mxu0  ;;  %v493_v34 = vsel %vm181_vm2, %v406_v30, -inf  ;;  %v496_v35 = vsel %vm181_vm2, %v483_v31, -inf }
 0x26c   :  { %494 = vmax.xlane.f32.xlu0 %v493_v34 }
 0x270   :  { %497 = vmax.xlane.f32.xlu0 %v496_v35 }
 0x279   :  { %559 = vrot.lane.b32.xlu1 %v3811_v14, %s3697_s2 }
 0x2f1   :  { %v489_v36 = vpop.xlane.xlu0 %488 }
 0x2f2   :  { %v499_v37 = vsub.f32 %v252_v24, %v489_v36 }
 0x2f4   :  { %v503_v38 = vmul.f32 1.442695, %v499_v37 }
 0x2f5   :  { %v492_v39 = vpop.xlane.xlu1 %491 }
 0x2f6   :  { %3507 = vpow2.f32 %v503_v38  ;;  %v500_v40 = vsub.f32 %v329_v27, %v492_v39 }
 0x2f8   :  { %v505_v41 = vmul.f32 1.442695, %v500_v40 }
 0x2f9   :  { %v560_v42 = vpop.permute.xlu1 %559  ;;  %v495_v43 = vpop.xlane.xlu0 %494 }
 0x2fa   :  { %3509 = vpow2.f32 %v505_v41  ;;  %v501_v44 = vsub.f32 %v406_v30, %v495_v43  ;;  %3316 = vmatpush3.msra.mxu1 %v560_v42 }
 0x2fb   :  { %3325 = vmatprep.subr.mxu1 %v3694_v10 }
 0x2fc   :  { %v507_v45 = vmul.f32 1.442695, %v501_v44 }
 0x2fd   :  { %v498_v46 = vpop.xlane.xlu0 %497 }
 0x2fe   :  { %3511 = vpow2.f32 %v507_v45  ;;  %v502_v47 = vsub.f32 %v483_v31, %v498_v46 }
 0x300   :  { %v3508_v48 = vpop.eup %3507  ;;  %v509_v49 = vmul.f32 1.442695, %v502_v47 }
 0x301   :  { %v511_v50 = vsel %vm181_vm2, %v3508_v48, 0.0 }
 0x302   :  { %3513 = vpow2.f32 %v509_v49  ;;  %512 = vadd.xlane.f32.xlu1 %v511_v50 }
 0x304   :  { %v3855_v51 = vpop.eup %3509 }
 0x305   :  { %v514_v52 = vsel %vm181_vm2, %v3855_v51, 0.0 }
 0x306   :  { %515 = vadd.xlane.f32.xlu0 %v514_v52 }
 0x308   :  { %v3859_v53 = vpop.eup %3511 }
 0x309   :  { %v517_v54 = vsel %vm181_vm2, %v3859_v53, 0.0 }
 0x30a   :  { %518 = vadd.xlane.f32.xlu1 %v517_v54 }
 0x30c   :  { %v3863_v55 = vpop.eup %3513 }
 0x30d   :  { %v520_v56 = vsel %vm181_vm2, %v3863_v55, 0.0 }
 0x30e   :  { %521 = vadd.xlane.f32.xlu0 %v520_v56 }
 0x31b   :  { %711 = vrot.lane.b32.xlu1 %v3816_v18, %s3697_s2 }
 0x31f   :  { %787 = vrot.lane.b32.xlu1 %v3818_v19, %s3697_s2 }
 0x323   :  { %943 = vrot.lane.b32.xlu1 %v3814_v17, %s3698_s13 }
 0x324   :  { %635 = vrot.lane.b32.xlu0 %v3814_v17, %s3697_s2 }
 0x327   :  { %941 = vrot.lane.b32.xlu1 %v3814_v17, %s3699_s14 }
 0x328   :  { %865 = vrot.lane.b32.xlu0 %v3811_v14, %s3698_s13 }
 0x32b   :  { %1099 = vrot.lane.b32.xlu1 %v3818_v19, %s3698_s13 }
 0x32c   :  { %863 = vrot.lane.b32.xlu0 %v3811_v14, %s3699_s14 }
 0x32f   :  { %1097 = vrot.lane.b32.xlu1 %v3818_v19, %s3699_s14 }
 0x330   :  { %1021 = vrot.lane.b32.xlu0 %v3816_v18, %s3698_s13 }
 0x334   :  { %1019 = vrot.lane.b32.xlu0 %v3816_v18, %s3699_s14 }
 0x38f   :  { %v513_v57 = vpop.xlane.xlu1 %512 }
 0x390   :  { %3515 = vrcp.f32 %v513_v57 }
 0x393   :  { %v516_v58 = vpop.xlane.xlu0 %515 }
 0x394   :  { %3517 = vrcp.f32 %v516_v58 }
 0x397   :  { %v519_v59 = vpop.xlane.xlu1 %518 }
 0x398   :  { %3519 = vrcp.f32 %v519_v59 }
 0x39a   :  { %v3516_v60 = vpop.eup %3515 }
 0x39b   :  { %v527_v61 = vmul.f32 %v3516_v60, %v513_v57  ;;  %v522_v62 = vpop.xlane.xlu0 %521  ;;  %v712_v1 = vpop.permute.xlu1 %711 }
 0x39c   :  { %3521 = vrcp.f32 %v522_v62 }
 0x39d   :  { %v531_v63 = vsub.f32 2.0, %v527_v61 }
 0x39e   :  { %v3518_v0 = vpop.eup %3517 }
 0x39f   :  { %v535_v2 = vmul.f32 %v3516_v60, %v531_v63  ;;  %v528_v3 = vmul.f32 %v3518_v0, %v516_v58  ;;  %v636_v4 = vpop.permute.xlu0 %635  ;;  %v788_v12 = vpop.permute.xlu1 %787 }
 0x3a0   :  { %3321 = vmatpush3.msra.mxu0 %v636_v4 }
 0x3a1   :  { %v539_v5 = vmul.f32 %v535_v2, %v513_v57  ;;  %v532_v6 = vsub.f32 2.0, %v528_v3  ;;  %3330 = vmatprep.subr.mxu0 %v3694_v10 }
 0x3a2   :  { %v3520_v7 = vpop.eup %3519 }
 0x3a3   :  { %v543_v8 = vsub.f32 2.0, %v539_v5  ;;  %v536_v9 = vmul.f32 %v3518_v0, %v532_v6  ;;  %v529_v11 = vmul.f32 %v3520_v7, %v519_v59  ;;  %v866_v21 = vpop.permute.xlu0 %865  ;;  %v944_v29 = vpop.permute.xlu1 %943 }
 0x3a5   :  { %v547_v13 = vmul.f32 %v543_v8, %v535_v2  ;;  %v540_v15 = vmul.f32 %v536_v9, %v516_v58  ;;  %v533_v16 = vsub.f32 2.0, %v529_v11 }
 0x3a6   :  { %v3522_v20 = vpop.eup %3521 }
 0x3a7   :  { %v3882_v22 = vmul.f32 %v3508_v48, %v547_v13  ;;  %v544_v23 = vsub.f32 2.0, %v540_v15  ;;  %v537_v24 = vmul.f32 %v3520_v7, %v533_v16  ;;  %v530_v25 = vmul.f32 %v3522_v20, %v522_v62  ;;  %v864_v33 = vpop.permute.xlu0 %863  ;;  %v942_v38 = vpop.permute.xlu1 %941 }
 0x3a9   :  { %v548_v26 = vmul.f32 %v544_v23, %v536_v9  ;;  %v541_v27 = vmul.f32 %v537_v24, %v519_v59  ;;  %v534_v28 = vsub.f32 2.0, %v530_v25  ;;  %3318 = vmatmul.mubr.msk.f32.vlgmr.msra.gmra.mrb[4].mxu1 %vm181_vm2, %v3882_v22 }
 0x3aa   :  { %3326 = vmatpush3.msra.mxu1 %v712_v1  ;;  %3327 = vmatprep.mubr.msk.f32.mxu1 %vm3695_vm1, %v3694_v10 }
 0x3ab   :  { %v3889_v30 = vmul.f32 %v3855_v51, %v548_v26  ;;  %v545_v31 = vsub.f32 2.0, %v541_v27  ;;  %v538_v32 = vmul.f32 %v3522_v20, %v534_v28  ;;  %3335 = vmatprep.subr.mxu1 %v3694_v10  ;;  %v1022_v40 = vpop.permute.xlu0 %1021  ;;  %v1100_v42 = vpop.permute.xlu1 %1099 }
 0x3ad   :  { %v549_v34 = vmul.f32 %v545_v31, %v537_v24  ;;  %v542_v35 = vmul.f32 %v538_v32, %v522_v62  ;;  %3323 = vmatmul.mubr.msk.f32.vlgmr.msra.gmra.mrb[8].mxu0 %vm181_vm2, %v3889_v30 }
 0x3ae   :  { %3331 = vmatpush3.msra.mxu0 %v788_v12  ;;  %3332 = vmatprep.mubr.msk.f32.mxu0 %vm3695_vm1, %v3694_v10 }
 0x3af   :  { %v3897_v36 = vmul.f32 %v3859_v53, %v549_v34  ;;  %v546_v37 = vsub.f32 2.0, %v542_v35  ;;  %3340 = vmatprep.subr.mxu0 %v3694_v10  ;;  %v1020_v43 = vpop.permute.xlu0 %1019  ;;  %v1098_v44 = vpop.permute.xlu1 %1097 }
 0x3b1   :  { %v550_v39 = vmul.f32 %v546_v37, %v538_v32  ;;  %3328 = vmatmul.mubr.msk.f32.vlgmr.msra.gmra.mrb[6].mxu1 %vm181_vm2, %v3897_v36 }
 0x3b2   :  { %3336 = vmatpush3.xpose.msk.msra.mxu1 %vm181_vm2, %v866_v21  ;;  %3337 = vmatprep.mubr.msk.f32.mxu1 %vm3695_vm1, %v3694_v10 }
 0x3b3   :  { %v3906_v41 = vmul.f32 %v3863_v55, %v550_v39  ;;  %3345 = vmatprep.subr.mxu1 %v3694_v10 }
 0x3b5   :  { %3333 = vmatmul.mubr.msk.f32.vlgmr.msra.gmra.mrb[10].mxu0 %vm181_vm2, %v3906_v41  ;;  %3338 = vmatmul.mubr.msk.f32.vlgmr.msra.gmra.mrb[8].mxu1 %vm181_vm2, %v864_v33 }
 0x3b6   :  { %3341 = vmatpush3.xpose.msk.msra.mxu0 %vm181_vm2, %v944_v29  ;;  %3346 = vmatpush3.xpose.msk.msra.mxu1 %vm181_vm2, %v1022_v40 }
 0x3b7   :  { %3342 = vmatprep.mubr.msk.f32.mxu0 %vm3695_vm1, %v3694_v10  ;;  %3347 = vmatprep.mubr.msk.f32.mxu1 %vm3695_vm1, %v3694_v10 }
 0x3b8   :  { %3350 = vmatprep.subr.mxu0 %v3694_v10  ;;  %3355 = vmatprep.subr.mxu1 %v3694_v10 }
 0x3b9   :  { %3343 = vmatmul.mubr.msk.f32.vlgmr.msra.gmra.mrb[12].mxu0 %vm181_vm2, %v942_v38  ;;  %3348 = vmatmul.mubr.msk.f32.vlgmr.msra.gmra.mrb[10].mxu1 %vm181_vm2, %v1020_v43 }
 0x3ba   :  { %3351 = vmatpush3.xpose.msk.msra.mxu0 %vm181_vm2, %v1100_v42  ;;  %3352 = vmatprep.mubr.msk.f32.mxu0 %vm3695_vm1, %v3694_v10 }
 0x3bb   :  { %3360 = vmatprep.subr.mxu0 %v3694_v10  ;;  %3357 = vmatprep.mubr.msk.f32.mxu1 %vm3695_vm1, %v3694_v10 }
 0x3bd   :  { %3353 = vmatmul.mubr.msk.f32.vlgmr.msra.gmra.mrb[14].mxu0 %vm181_vm2, %v1098_v44 }
 0x3be   :  { %3362 = vmatprep.mubr.msk.f32.mxu0 %vm3695_vm1, %v3694_v10 }
 0x47c   :  { %v3931_v45 = vpop.f32.mrb[4].mxu1 }
 0x47d   :  { %v3319_v46 = vpop.f32.mrb[5].mxu1 }
 0x480   :  { %v3933_v47 = vpop.f32.mrb[8].mxu0 }
 0x481   :  { %v3324_v48 = vpop.f32.mrb[9].mxu0 }
 0x484   :  { %v3935_v49 = vpop.f32.mrb[6].mxu1 }
 0x485   :  { %v3329_v50 = vpop.f32.mrb[7].mxu1 }
 0x488   :  { %v3937_v51 = vpop.f32.mrb[10].mxu0  ;;  %v937_v52 = vpop.f32.mrb[8].mxu1 }
 0x489   :  { %v3334_v53 = vpop.f32.mrb[11].mxu0  ;;  %v3339_v54 = vpop.f32.mrb[9].mxu1  ;;  %v1175_v55 = vsel %vm181_vm2, %v937_v52, -inf }
 0x48a   :  { %1176 = vmax.xlane.f32.xlu0 %v1175_v55 }
 0x48c   :  { %v1015_v56 = vpop.f32.mrb[12].mxu0  ;;  %v1093_v57 = vpop.f32.mrb[10].mxu1 }
 0x48d   :  { %v3344_v58 = vpop.f32.mrb[13].mxu0  ;;  %v3349_v59 = vpop.f32.mrb[11].mxu1  ;;  %v1178_v60 = vsel %vm181_vm2, %v1015_v56, -inf  ;;  %v1181_v61 = vsel %vm181_vm2, %v1093_v57, -inf }
 0x48e   :  { %1179 = vmax.xlane.f32.xlu1 %v1178_v60  ;;  %1182 = vmax.xlane.f32.xlu0 %v1181_v61 }
 0x490   :  { %v1171_v62 = vpop.f32.mrb[14].mxu0 }
 0x491   :  { %v3354_v63 = vpop.f32.mrb[15].mxu0  ;;  %v1184_v0 = vsel %vm181_vm2, %v1171_v62, -inf }
 0x492   :  { %1185 = vmax.xlane.f32.xlu0 %v1184_v0 }
 0x49f   :  { %1247 = vrot.lane.b32.xlu1 %v3811_v14, %s3700_s15 }
 0x517   :  { %v1177_v1 = vpop.xlane.xlu0 %1176 }
 0x518   :  { %v1187_v2 = vsub.f32 %v937_v52, %v1177_v1 }
 0x51a   :  { %v1191_v3 = vmul.f32 1.442695, %v1187_v2 }
 0x51b   :  { %v1180_v4 = vpop.xlane.xlu1 %1179  ;;  %v1183_v5 = vpop.xlane.xlu0 %1182 }
 0x51c   :  { %3523 = vpow2.f32 %v1191_v3  ;;  %v1188_v6 = vsub.f32 %v1015_v56, %v1180_v4  ;;  %v1189_v24 = vsub.f32 %v1093_v57, %v1183_v5 }
 0x51e   :  { %v1193_v7 = vmul.f32 1.442695, %v1188_v6  ;;  %v1195_v25 = vmul.f32 1.442695, %v1189_v24 }
 0x51f   :  { %v1248_v8 = vpop.permute.xlu1 %1247  ;;  %v1186_v9 = vpop.xlane.xlu0 %1185 }
 0x520   :  { %3525 = vpow2.f32 %v1193_v7  ;;  %v1190_v11 = vsub.f32 %v1171_v62, %v1186_v9  ;;  %3356 = vmatpush3.msra.mxu1 %v1248_v8 }
 0x521   :  { %3365 = vmatprep.subr.mxu1 %v3694_v10 }
 0x522   :  { %v1197_v12 = vmul.f32 1.442695, %v1190_v11 }
 0x524   :  { %3527 = vpow2.f32 %v1197_v12 }
 0x525   :  { %3529 = vpow2.f32 %v1195_v25 }
 0x526   :  { %v3524_v13 = vpop.eup %3523 }
 0x527   :  { %v1199_v15 = vsel %vm181_vm2, %v3524_v13, 0.0 }
 0x528   :  { %1200 = vadd.xlane.f32.xlu1 %v1199_v15 }
 0x52a   :  { %v3526_v16 = vpop.eup %3525 }
 0x52b   :  { %v1202_v20 = vsel %vm181_vm2, %v3526_v16, 0.0 }
 0x52c   :  { %1203 = vadd.xlane.f32.xlu0 %v1202_v20 }
 0x52e   :  { %v3948_v21 = vpop.eup %3527 }
 0x52f   :  { %v1208_v23 = vsel %vm181_vm2, %v3948_v21, 0.0  ;;  %v3960_v26 = vpop.eup %3529 }
 0x530   :  { %1209 = vadd.xlane.f32.xlu0 %v1208_v23  ;;  %v1205_v27 = vsel %vm181_vm2, %v3960_v26, 0.0 }
 0x539   :  { %1399 = vrot.lane.b32.xlu1 %v3816_v18, %s3700_s15 }
 0x546   :  { %1323 = vrot.lane.b32.xlu0 %v3814_v17, %s3700_s15 }
 0x54a   :  { %1553 = vrot.lane.b32.xlu0 %v3811_v14, %s3701_s16 }
 0x54e   :  { %1551 = vrot.lane.b32.xlu0 %v3811_v14, %s3702_s17 }
 0x552   :  { %1709 = vrot.lane.b32.xlu0 %v3816_v18, %s3701_s16 }
 0x556   :  { %1707 = vrot.lane.b32.xlu0 %v3816_v18, %s3702_s17 }
 0x55d   :  { %1206 = vadd.xlane.f32.xlu1 %v1205_v27 }
 0x56e   :  { %1475 = vrot.lane.b32.xlu1 %v3818_v19, %s3700_s15 }
 0x572   :  { %1631 = vrot.lane.b32.xlu1 %v3814_v17, %s3701_s16 }
 0x576   :  { %1629 = vrot.lane.b32.xlu1 %v3814_v17, %s3702_s17 }
 0x57a   :  { %1787 = vrot.lane.b32.xlu1 %v3818_v19, %s3701_s16 }
 0x57e   :  { %1785 = vrot.lane.b32.xlu1 %v3818_v19, %s3702_s17 }
 0x5b5   :  { %v1201_v28 = vpop.xlane.xlu1 %1200 }
 0x5b6   :  { %3531 = vrcp.f32 %v1201_v28 }
 0x5b9   :  { %v1204_v29 = vpop.xlane.xlu0 %1203  ;;  %v1400_v53 = vpop.permute.xlu1 %1399 }
 0x5ba   :  { %3533 = vrcp.f32 %v1204_v29 }
 0x5bd   :  { %v1210_v31 = vpop.xlane.xlu0 %1209 }
 0x5be   :  { %3535 = vrcp.f32 %v1210_v31 }
 0x5c0   :  { %v3532_v32 = vpop.eup %3531 }
 0x5c1   :  { %v1215_v33 = vmul.f32 %v3532_v32, %v1201_v28  ;;  %v1324_v34 = vpop.permute.xlu0 %1323 }
 0x5c2   :  { %3361 = vmatpush3.msra.mxu0 %v1324_v34 }
 0x5c3   :  { %v1219_v35 = vsub.f32 2.0, %v1215_v33  ;;  %3370 = vmatprep.subr.mxu0 %v3694_v10 }
 0x5c4   :  { %v3534_v37 = vpop.eup %3533 }
 0x5c5   :  { %v1223_v38 = vmul.f32 %v3532_v32, %v1219_v35  ;;  %v1216_v39 = vmul.f32 %v3534_v37, %v1204_v29  ;;  %v1554_v7 = vpop.permute.xlu0 %1553 }
 0x5c7   :  { %v1227_v40 = vmul.f32 %v1223_v38, %v1201_v28  ;;  %v1220_v42 = vsub.f32 2.0, %v1216_v39 }
 0x5c8   :  { %v3536_v56 = vpop.eup %3535 }
 0x5c9   :  { %v1231_v43 = vsub.f32 2.0, %v1227_v40  ;;  %v1224_v44 = vmul.f32 %v3534_v37, %v1220_v42  ;;  %v1218_v57 = vmul.f32 %v3536_v56, %v1210_v31  ;;  %v1552_v15 = vpop.permute.xlu0 %1551 }
 0x5cb   :  { %v1235_v46 = vmul.f32 %v1231_v43, %v1223_v38  ;;  %v1228_v48 = vmul.f32 %v1224_v44, %v1204_v29  ;;  %v1222_v58 = vsub.f32 2.0, %v1218_v57 }
 0x5cd   :  { %v3971_v50 = vmul.f32 %v3524_v13, %v1235_v46  ;;  %v1232_v52 = vsub.f32 2.0, %v1228_v48  ;;  %v1226_v59 = vmul.f32 %v3536_v56, %v1222_v58 }
 0x5cf   :  { %v1236_v54 = vmul.f32 %v1232_v52, %v1224_v44  ;;  %3358 = vmatmul.mubr.msk.f32.vlgmr.msra.gmra.mrb[12].mxu1 %vm181_vm2, %v3971_v50  ;;  %v1230_v60 = vmul.f32 %v1226_v59, %v1210_v31 }
 0x5d0   :  { %3366 = vmatpush3.msra.mxu1 %v1400_v53  ;;  %3367 = vmatprep.mubr.msk.f32.mxu1 %vm3695_vm1, %v3694_v10 }
 0x5d1   :  { %v3977_v55 = vmul.f32 %v3526_v16, %v1236_v54  ;;  %3375 = vmatprep.subr.mxu1 %v3694_v10  ;;  %v1234_v61 = vsub.f32 2.0, %v1230_v60 }
 0x5d3   :  { %3363 = vmatmul.mubr.msk.f32.vlgmr.msra.gmra.mrb[16].mxu0 %vm181_vm2, %v3977_v55  ;;  %v1238_v62 = vmul.f32 %v1234_v61, %v1226_v59 }
 0x5d4   :  { %3372 = vmatprep.mubr.msk.f32.mxu0 %vm3695_vm1, %v3694_v10 }
 0x5d5   :  { %v3985_v0 = vmul.f32 %v3948_v21, %v1238_v62  ;;  %v1710_v21 = vpop.permute.xlu0 %1709 }
 0x5d9   :  { %v1708_v23 = vpop.permute.xlu0 %1707 }
 0x5ea   :  { %v1207_v63 = vpop.xlane.xlu1 %1206 }
 0x5eb   :  { %3537 = vrcp.f32 %v1207_v63 }
 0x5ee   :  { %v1476_v1 = vpop.permute.xlu1 %1475 }
 0x5ef   :  { %3371 = vmatpush3.msra.mxu0 %v1476_v1 }
 0x5f0   :  { %3373 = vmatmul.mubr.msk.f32.vlgmr.msra.gmra.mrb[18].mxu0 %vm181_vm2, %v3985_v0  ;;  %3380 = vmatprep.subr.mxu0 %v3694_v10 }
 0x5f1   :  { %3382 = vmatprep.mubr.msk.f32.mxu0 %vm3695_vm1, %v3694_v10 }
 0x5f2   :  { %v1632_v2 = vpop.permute.xlu1 %1631 }
 0x5f5   :  { %v3538_v3 = vpop.eup %3537 }
 0x5f6   :  { %v1217_v4 = vmul.f32 %v3538_v3, %v1207_v63  ;;  %v1630_v5 = vpop.permute.xlu1 %1629  ;;  %3381 = vmatpush3.xpose.msk.msra.mxu0 %vm181_vm2, %v1632_v2 }
 0x5f7   :  { %3390 = vmatprep.subr.mxu0 %v3694_v10 }
 0x5f8   :  { %v1221_v6 = vsub.f32 2.0, %v1217_v4 }
 0x5f9   :  { %3383 = vmatmul.mubr.msk.f32.vlgmr.msra.gmra.mrb[20].mxu0 %vm181_vm2, %v1630_v5 }
 0x5fa   :  { %v1225_v8 = vmul.f32 %v3538_v3, %v1221_v6  ;;  %v1788_v9 = vpop.permute.xlu1 %1787  ;;  %3392 = vmatprep.mubr.msk.f32.mxu0 %vm3695_vm1, %v3694_v10 }
 0x5fb   :  { %3391 = vmatpush3.xpose.msk.msra.mxu0 %vm181_vm2, %v1788_v9 }
 0x5fc   :  { %v1229_v11 = vmul.f32 %v1225_v8, %v1207_v63  ;;  %3400 = vmatprep.subr.mxu0 %v3694_v10 }
 0x5fe   :  { %v1233_v12 = vsub.f32 2.0, %v1229_v11  ;;  %v1786_v13 = vpop.permute.xlu1 %1785 }
 0x5ff   :  { %3393 = vmatmul.mubr.msk.f32.vlgmr.msra.gmra.mrb[22].mxu0 %vm181_vm2, %v1786_v13 }
 0x600   :  { %v1237_v16 = vmul.f32 %v1233_v12, %v1225_v8  ;;  %3402 = vmatprep.mubr.msk.f32.mxu0 %vm3695_vm1, %v3694_v10 }
 0x602   :  { %v4003_v20 = vmul.f32 %v3960_v26, %v1237_v16 }
 0x604   :  { %3368 = vmatmul.mubr.msk.f32.vlgmr.msra.gmra.mrb[14].mxu1 %vm181_vm2, %v4003_v20 }
 0x605   :  { %3376 = vmatpush3.xpose.msk.msra.mxu1 %vm181_vm2, %v1554_v7  ;;  %3377 = vmatprep.mubr.msk.f32.mxu1 %vm3695_vm1, %v3694_v10 }
 0x606   :  { %3385 = vmatprep.subr.mxu1 %v3694_v10 }
 0x608   :  { %3378 = vmatmul.mubr.msk.f32.vlgmr.msra.gmra.mrb[16].mxu1 %vm181_vm2, %v1552_v15 }
 0x609   :  { %3386 = vmatpush3.xpose.msk.msra.mxu1 %vm181_vm2, %v1710_v21  ;;  %3387 = vmatprep.mubr.msk.f32.mxu1 %vm3695_vm1, %v3694_v10 }
 0x60a   :  { %3395 = vmatprep.subr.mxu1 %v3694_v10 }
 0x60c   :  { %3388 = vmatmul.mubr.msk.f32.vlgmr.msra.gmra.mrb[18].mxu1 %vm181_vm2, %v1708_v23 }
 0x60d   :  { %3397 = vmatprep.mubr.msk.f32.mxu1 %vm3695_vm1, %v3694_v10 }
 0x6a2   :  { %v4019_v24 = vpop.f32.mrb[12].mxu1 }
 0x6a3   :  { %v3359_v25 = vpop.f32.mrb[13].mxu1 }
 0x6a6   :  { %v4021_v26 = vpop.f32.mrb[16].mxu0 }
 0x6a7   :  { %v3364_v27 = vpop.f32.mrb[17].mxu0 }
 0x6c3   :  { %v4023_v28 = vpop.f32.mrb[18].mxu0 }
 0x6c4   :  { %v3374_v29 = vpop.f32.mrb[19].mxu0 }
 0x6cc   :  { %v1703_v31 = vpop.f32.mrb[20].mxu0 }
 0x6cd   :  { %v3384_v32 = vpop.f32.mrb[21].mxu0  ;;  %v1866_v33 = vsel %vm181_vm2, %v1703_v31, -inf }
 0x6ce   :  { %1867 = vmax.xlane.f32.xlu1 %v1866_v33  ;;  %v1244_v33 = vadd.f32 %v3977_v55, %v3889_v30 }
 0x6d2   :  { %v1859_v34 = vpop.f32.mrb[22].mxu0 }
 0x6d3   :  { %v3394_v35 = vpop.f32.mrb[23].mxu0  ;;  %v1872_v48 = vsel %vm181_vm2, %v1859_v34, -inf }
 0x6d7   :  { %v4026_v37 = vpop.f32.mrb[14].mxu1 }
 0x6d8   :  { %v3369_v38 = vpop.f32.mrb[15].mxu1 }
 0x6db   :  { %v1625_v39 = vpop.f32.mrb[16].mxu1 }
 0x6dc   :  { %v3379_v40 = vpop.f32.mrb[17].mxu1  ;;  %v1863_v42 = vsel %vm181_vm2, %v1625_v39, -inf }
 0x6dd   :  { %1864 = vmax.xlane.f32.xlu0 %v1863_v42 }
 0x6df   :  { %1935 = vrot.lane.b32.xlu1 %v3811_v14, %s3703_s18  ;;  %v1781_v43 = vpop.f32.mrb[18].mxu1 }
 0x6e0   :  { %v3389_v44 = vpop.f32.mrb[19].mxu1  ;;  %v1869_v46 = vsel %vm181_vm2, %v1781_v43, -inf }
 0x6e1   :  { %1870 = vmax.xlane.f32.xlu0 %v1869_v46 }
 0x6e5   :  { %1873 = vmax.xlane.f32.xlu0 %v1872_v48 }
 0x75b   :  { %v1868_v52 = vpop.xlane.xlu1 %1867 }
 0x75c   :  { %v1876_v53 = vsub.f32 %v1703_v31, %v1868_v52 }
 0x75e   :  { %v1881_v54 = vmul.f32 1.442695, %v1876_v53 }
 0x75f   :  { %v1936_v56 = vpop.permute.xlu1 %1935 }
 0x760   :  { %3539 = vpow2.f32 %v1881_v54  ;;  %3396 = vmatpush3.msra.mxu1 %v1936_v56  ;;  %v1243_v54 = vadd.f32 %v3971_v50, %v3882_v22 }
 0x761   :  { %3405 = vmatprep.subr.mxu1 %v3694_v10 }
 0x76a   :  { %v3540_v57 = vpop.eup %3539  ;;  %v1865_v58 = vpop.xlane.xlu0 %1864 }
 0x76b   :  { %v1875_v59 = vsub.f32 %v1625_v39, %v1865_v58  ;;  %v1890_v60 = vsel %vm181_vm2, %v3540_v57, 0.0 }
 0x76c   :  { %1891 = vadd.xlane.f32.xlu0 %v1890_v60 }
 0x76d   :  { %v1879_v61 = vmul.f32 1.442695, %v1875_v59 }
 0x76e   :  { %v1871_v62 = vpop.xlane.xlu0 %1870 }
 0x76f   :  { %3541 = vpow2.f32 %v1879_v61  ;;  %v1877_v7 = vsub.f32 %v1781_v43, %v1871_v62  ;;  %v1246_v62 = vadd.f32 %v3985_v0, %v3906_v41 }
 0x771   :  { %v1883_v8 = vmul.f32 1.442695, %v1877_v7 }
 0x772   :  { %v1874_v63 = vpop.xlane.xlu0 %1873 }
 0x773   :  { %v1878_v1 = vsub.f32 %v1859_v34, %v1874_v63 }
 0x775   :  { %v1885_v2 = vmul.f32 1.442695, %v1878_v1 }
 0x777   :  { %3543 = vpow2.f32 %v1885_v2 }
 0x778   :  { %3545 = vpow2.f32 %v1883_v8 }
 0x779   :  { %v3542_v3 = vpop.eup %3541 }
 0x77a   :  { %v1887_v4 = vsel %vm181_vm2, %v3542_v3, 0.0 }
 0x77b   :  { %1888 = vadd.xlane.f32.xlu1 %v1887_v4 }
 0x781   :  { %v4036_v5 = vpop.eup %3543 }
 0x782   :  { %v1896_v6 = vsel %vm181_vm2, %v4036_v5, 0.0  ;;  %v4050_v9 = vpop.eup %3545 }
 0x783   :  { %1897 = vadd.xlane.f32.xlu0 %v1896_v6  ;;  %v1893_v11 = vsel %vm181_vm2, %v4050_v9, 0.0 }
 0x78c   :  { %2087 = vrot.lane.b32.xlu1 %v3816_v18, %s3703_s18 }
 0x790   :  { %2163 = vrot.lane.b32.xlu1 %v3818_v19, %s3703_s18 }
 0x799   :  { %2011 = vrot.lane.b32.xlu0 %v3814_v17, %s3703_s18 }
 0x79d   :  { %2241 = vrot.lane.b32.xlu0 %v3811_v14, %s3704_s19 }
 0x7a1   :  { %2239 = vrot.lane.b32.xlu0 %v3811_v14, %s3705_s20 }
 0x7a5   :  { %2397 = vrot.lane.b32.xlu0 %v3816_v18, %s3704_s19 }
 0x7a9   :  { %2395 = vrot.lane.b32.xlu0 %v3816_v18, %s3705_s20 }
 0x7b4   :  { %1894 = vadd.xlane.f32.xlu1 %v1893_v11 }
 0x7c5   :  { %2319 = vrot.lane.b32.xlu1 %v3814_v17, %s3704_s19 }
 0x7c9   :  { %2317 = vrot.lane.b32.xlu1 %v3814_v17, %s3705_s20 }
 0x7cd   :  { %2475 = vrot.lane.b32.xlu1 %v3818_v19, %s3704_s19 }
 0x7d1   :  { %2473 = vrot.lane.b32.xlu1 %v3818_v19, %s3705_s20 }
 0x7f9   :  { %v1892_v12 = vpop.xlane.xlu0 %1891 }
 0x7fa   :  { %3547 = vrcp.f32 %v1892_v12 }
 0x804   :  { %v3548_v13 = vpop.eup %3547 }
 0x805   :  { %v1904_v15 = vmul.f32 %v3548_v13, %v1892_v12 }
 0x807   :  { %v1908_v16 = vsub.f32 2.0, %v1904_v15  ;;  %v1245_v15 = vadd.f32 %v4003_v20, %v3897_v36 }
 0x808   :  { %v1889_v21 = vpop.xlane.xlu1 %1888 }
 0x809   :  { %v1912_v23 = vmul.f32 %v3548_v13, %v1908_v16  ;;  %3549 = vrcp.f32 %v1889_v21 }
 0x80b   :  { %v1916_v25 = vmul.f32 %v1912_v23, %v1892_v12 }
 0x80c   :  { %v2088_v31 = vpop.permute.xlu1 %2087 }
 0x80d   :  { %v1920_v27 = vsub.f32 2.0, %v1916_v25 }
 0x80f   :  { %v1924_v29 = vmul.f32 %v1920_v27, %v1912_v23 }
 0x810   :  { %v1898_v32 = vpop.xlane.xlu0 %1897  ;;  %v2164_v43 = vpop.permute.xlu1 %2163 }
 0x811   :  { %v1928_v34 = vmul.f32 %v3540_v57, %v1924_v29  ;;  %3551 = vrcp.f32 %v1898_v32 }
 0x813   :  { %v3550_v35 = vpop.eup %3549  ;;  %v4060_v38 = vadd.f32 %v1928_v34, %v1244_v33 }
 0x814   :  { %v1903_v39 = vmul.f32 %v3550_v35, %v1889_v21  ;;  %v2012_v40 = vpop.permute.xlu0 %2011 }
 0x815   :  { %3401 = vmatpush3.msra.mxu0 %v2012_v40 }
 0x816   :  { %v1907_v42 = vsub.f32 2.0, %v1903_v39  ;;  %3403 = vmatmul.mubr.msk.f32.vlgmr.msra.gmra.mrb[24].mxu0 %vm181_vm2, %v1928_v34  ;;  %3410 = vmatprep.subr.mxu0 %v3694_v10 }
 0x817   :  { %3411 = vmatpush3.msra.mxu0 %v2164_v43  ;;  %3412 = vmatprep.mubr.msk.f32.mxu0 %vm3695_vm1, %v3694_v10 }
 0x818   :  { %v1911_v44 = vmul.f32 %v3550_v35, %v1907_v42  ;;  %3420 = vmatprep.subr.mxu0 %v3694_v10 }
 0x81a   :  { %v1915_v30 = vmul.f32 %v1911_v44, %v1889_v21 }
 0x81b   :  { %v3552_v55 = vpop.eup %3551 }
 0x81c   :  { %v1919_v46 = vsub.f32 2.0, %v1915_v30  ;;  %v1906_v48 = vmul.f32 %v3552_v55, %v1898_v32 }
 0x81e   :  { %v1923_v52 = vmul.f32 %v1919_v46, %v1911_v44  ;;  %v1910_v53 = vsub.f32 2.0, %v1906_v48 }
 0x820   :  { %v1927_v56 = vmul.f32 %v3542_v3, %v1923_v52  ;;  %v1914_v57 = vmul.f32 %v3552_v55, %v1910_v53 }
 0x822   :  { %v4069_v58 = vadd.f32 %v1927_v56, %v1243_v54  ;;  %v1918_v59 = vmul.f32 %v1914_v57, %v1898_v32  ;;  %3398 = vmatmul.mubr.msk.f32.vlgmr.msra.gmra.mrb[20].mxu1 %vm181_vm2, %v1927_v56 }
 0x823   :  { %3406 = vmatpush3.msra.mxu1 %v2088_v31  ;;  %3407 = vmatprep.mubr.msk.f32.mxu1 %vm3695_vm1, %v3694_v10 }
 0x824   :  { %v1922_v60 = vsub.f32 2.0, %v1918_v59  ;;  %3415 = vmatprep.subr.mxu1 %v3694_v10 }
 0x826   :  { %v1926_v61 = vmul.f32 %v1922_v60, %v1914_v57 }
 0x828   :  { %v1930_v22 = vmul.f32 %v4036_v5, %v1926_v61  ;;  %v2242_v5 = vpop.permute.xlu0 %2241 }
 0x82a   :  { %v4078_v50 = vadd.f32 %v1930_v22, %v1246_v62  ;;  %3413 = vmatmul.mubr.msk.f32.vlgmr.msra.gmra.mrb[26].mxu0 %vm181_vm2, %v1930_v22 }
 0x82b   :  { %3422 = vmatprep.mubr.msk.f32.mxu0 %vm3695_vm1, %v3694_v10 }
 0x82c   :  { %v2240_v12 = vpop.permute.xlu0 %2239 }
 0x830   :  { %v2398_v23 = vpop.permute.xlu0 %2397 }
 0x834   :  { %v2396_v36 = vpop.permute.xlu0 %2395 }
 0x841   :  { %v1895_v63 = vpop.xlane.xlu1 %1894 }
 0x842   :  { %3553 = vrcp.f32 %v1895_v63 }
 0x845   :  { %v2320_v1 = vpop.permute.xlu1 %2319 }
 0x846   :  { %3421 = vmatpush3.xpose.msk.msra.mxu0 %vm181_vm2, %v2320_v1 }
 0x847   :  { %3430 = vmatprep.subr.mxu0 %v3694_v10 }
 0x849   :  { %v2318_v2 = vpop.permute.xlu1 %2317 }
 0x84a   :  { %3423 = vmatmul.mubr.msk.f32.vlgmr.msra.gmra.mrb[28].mxu0 %vm181_vm2, %v2318_v2 }
 0x84b   :  { %3432 = vmatprep.mubr.msk.f32.mxu0 %vm3695_vm1, %v3694_v10 }
 0x84c   :  { %v3554_v41 = vpop.eup %3553 }
 0x84d   :  { %v1905_v0 = vmul.f32 %v3554_v41, %v1895_v63  ;;  %v2476_v3 = vpop.permute.xlu1 %2475 }
 0x84e   :  { %3431 = vmatpush3.xpose.msk.msra.mxu0 %vm181_vm2, %v2476_v3 }
 0x84f   :  { %v1909_v4 = vsub.f32 2.0, %v1905_v0  ;;  %3440 = vmatprep.subr.mxu0 %v3694_v10 }
 0x851   :  { %v1913_v6 = vmul.f32 %v3554_v41, %v1909_v4  ;;  %v2474_v7 = vpop.permute.xlu1 %2473 }
 0x852   :  { %3433 = vmatmul.mubr.msk.f32.vlgmr.msra.gmra.mrb[30].mxu0 %vm181_vm2, %v2474_v7 }
 0x853   :  { %v1917_v8 = vmul.f32 %v1913_v6, %v1895_v63  ;;  %3442 = vmatprep.mubr.msk.f32.mxu0 %vm3695_vm1, %v3694_v10 }
 0x855   :  { %v1921_v11 = vsub.f32 2.0, %v1917_v8 }
 0x857   :  { %v1925_v13 = vmul.f32 %v1921_v11, %v1913_v6 }
 0x859   :  { %v1929_v16 = vmul.f32 %v4050_v9, %v1925_v13 }
 0x85b   :  { %v4096_v21 = vadd.f32 %v1929_v16, %v1245_v15  ;;  %3408 = vmatmul.mubr.msk.f32.vlgmr.msra.gmra.mrb[22].mxu1 %vm181_vm2, %v1929_v16 }
 0x85c   :  { %3416 = vmatpush3.xpose.msk.msra.mxu1 %vm181_vm2, %v2242_v5  ;;  %3417 = vmatprep.mubr.msk.f32.mxu1 %vm3695_vm1, %v3694_v10 }
 0x85d   :  { %3425 = vmatprep.subr.mxu1 %v3694_v10 }
 0x85f   :  { %3418 = vmatmul.mubr.msk.f32.vlgmr.msra.gmra.mrb[24].mxu1 %vm181_vm2, %v2240_v12 }
 0x860   :  { %3426 = vmatpush3.xpose.msk.msra.mxu1 %vm181_vm2, %v2398_v23  ;;  %3427 = vmatprep.mubr.msk.f32.mxu1 %vm3695_vm1, %v3694_v10 }
 0x861   :  { %3435 = vmatprep.subr.mxu1 %v3694_v10 }
 0x863   :  { %3428 = vmatmul.mubr.msk.f32.vlgmr.msra.gmra.mrb[26].mxu1 %vm181_vm2, %v2396_v36 }
 0x864   :  { %3437 = vmatprep.mubr.msk.f32.mxu1 %vm3695_vm1, %v3694_v10 }
 0x8e9   :  { %v2083_v20 = vpop.f32.mrb[24].mxu0 }
 0x8ea   :  { %v3404_v9 = vpop.f32.mrb[25].mxu0 }
 0x8f5   :  { %v2007_v25 = vpop.f32.mrb[20].mxu1 }
 0x8f6   :  { %v3399_v27 = vpop.f32.mrb[21].mxu1 }
 0x8fd   :  { %v2235_v29 = vpop.f32.mrb[26].mxu0 }
 0x8fe   :  { %v3414_v31 = vpop.f32.mrb[27].mxu0 }
 0x91d   :  { %v2391_v32 = vpop.f32.mrb[28].mxu0 }
 0x91e   :  { %v3424_v33 = vpop.f32.mrb[29].mxu0  ;;  %v2554_v34 = vsel %vm181_vm2, %v2391_v32, -inf }
 0x91f   :  { %2555 = vmax.xlane.f32.xlu1 %v2554_v34 }
 0x925   :  { %v2547_v35 = vpop.f32.mrb[30].mxu0 }
 0x926   :  { %v3434_v39 = vpop.f32.mrb[31].mxu0  ;;  %v2560_v52 = vsel %vm181_vm2, %v2547_v35, -inf }
 0x92e   :  { %v2159_v40 = vpop.f32.mrb[22].mxu1 }
 0x92f   :  { %v3409_v42 = vpop.f32.mrb[23].mxu1 }
 0x932   :  { %v2313_v43 = vpop.f32.mrb[24].mxu1 }
 0x933   :  { %v3419_v44 = vpop.f32.mrb[25].mxu1  ;;  %v2551_v30 = vsel %vm181_vm2, %v2313_v43, -inf }
 0x934   :  { %2552 = vmax.xlane.f32.xlu0 %v2551_v30 }
 0x936   :  { %v2469_v55 = vpop.f32.mrb[26].mxu1 }
 0x937   :  { %v3429_v46 = vpop.f32.mrb[27].mxu1  ;;  %v2557_v48 = vsel %vm181_vm2, %v2469_v55, -inf }
 0x938   :  { %2558 = vmax.xlane.f32.xlu0 %v2557_v48 }
 0x93c   :  { %2561 = vmax.xlane.f32.xlu0 %v2560_v52 }
 0x9ac   :  { %v2556_v53 = vpop.xlane.xlu1 %2555 }
 0x9ad   :  { %v2564_v54 = vsub.f32 %v2391_v32, %v2556_v53 }
 0x9af   :  { %v2569_v56 = vmul.f32 1.442695, %v2564_v54 }
 0x9b1   :  { %3555 = vpow2.f32 %v2569_v56 }
 0x9bb   :  { %v3556_v57 = vpop.eup %3555 }
 0x9bc   :  { %v2578_v59 = vsel %vm181_vm2, %v3556_v57, 0.0 }
 0x9bd   :  { %2579 = vadd.xlane.f32.xlu0 %v2578_v59 }
 0x9c1   :  { %v2553_v60 = vpop.xlane.xlu0 %2552 }
 0x9c2   :  { %v2563_v61 = vsub.f32 %v2313_v43, %v2553_v60 }
 0x9c4   :  { %v2567_v62 = vmul.f32 1.442695, %v2563_v61 }
 0x9c5   :  { %v2559_v22 = vpop.xlane.xlu0 %2558 }
 0x9c6   :  { %3557 = vpow2.f32 %v2567_v62  ;;  %v2565_v5 = vsub.f32 %v2469_v55, %v2559_v22 }
 0x9c8   :  { %v2571_v6 = vmul.f32 1.442695, %v2565_v5 }
 0x9c9   :  { %v2562_v63 = vpop.xlane.xlu0 %2561 }
 0x9ca   :  { %v2566_v1 = vsub.f32 %v2547_v35, %v2562_v63  ;;  %v2989_v63 = vld [vmem:[#allocation7] sm:$0xff] }
 0x9cc   :  { %v2573_v2 = vmul.f32 1.442695, %v2566_v1  ;;  %v2990_v1 = vld [vmem:[#allocation7 + $0x8] sm:$0xff] }
 0x9ce   :  { %3559 = vpow2.f32 %v2573_v2  ;;  %v2991_v2 = vld [vmem:[#allocation7 + $0x10] sm:$0xff] }
 0x9cf   :  { %3561 = vpow2.f32 %v2571_v6 }
 0x9d0   :  { %v3558_v41 = vpop.eup %3557 }
 0x9d1   :  { %v2575_v0 = vsel %vm181_vm2, %v3558_v41, 0.0 }
 0x9d2   :  { %2576 = vadd.xlane.f32.xlu1 %v2575_v0  ;;  %v2992_v0 = vld [vmem:[#allocation7 + $0x18] sm:$0xff] }
 0x9d8   :  { %v4117_v3 = vpop.eup %3559 }
 0x9d9   :  { %v2584_v4 = vsel %vm181_vm2, %v4117_v3, 0.0  ;;  %v4127_v7 = vpop.eup %3561 }
 0x9da   :  { %2585 = vadd.xlane.f32.xlu0 %v2584_v4  ;;  %v2581_v8 = vsel %vm181_vm2, %v4127_v7, 0.0 }
 0x9e3   :  { %2623 = vrot.lane.b32.xlu1 %v3811_v14, %s3706_s1 }
 0x9f0   :  { %2699 = vrot.lane.b32.xlu0 %v3814_v17, %s3706_s1 }
 0x9f4   :  { %2931 = vrot.lane.b32.xlu0 %v4019_v24, %s3692_s10 }
 0x9f8   :  { %2947 = vrot.lane.b32.xlu0 %v2007_v25, %s3707_s21 }
 0x9fc   :  { %2935 = vrot.lane.b32.xlu0 %v4026_v37, %s3692_s10 }
 0xa00   :  { %2951 = vrot.lane.b32.xlu0 %v2159_v40, %s3707_s21 }
 0xa07   :  { %2582 = vadd.xlane.f32.xlu1 %v2581_v8 }
 0xa18   :  { %2775 = vrot.lane.b32.xlu1 %v3816_v18, %s3706_s1 }
 0xa1c   :  { %2851 = vrot.lane.b32.xlu1 %v3818_v19, %s3706_s1 }
 0xa20   :  { %2933 = vrot.lane.b32.xlu1 %v4021_v26, %s3692_s10 }
 0xa24   :  { %2949 = vrot.lane.b32.xlu1 %v2083_v20, %s3707_s21 }
 0xa28   :  { %2937 = vrot.lane.b32.xlu1 %v4023_v28, %s3692_s10 }
 0xa2c   :  { %2953 = vrot.lane.b32.xlu1 %v2235_v29, %s3707_s21 }
 0xa4a   :  { %v2580_v14 = vpop.xlane.xlu0 %2579 }
 0xa4b   :  { %3563 = vrcp.f32 %v2580_v14 }
 0xa55   :  { %v3564_v17 = vpop.eup %3563 }
 0xa56   :  { %v2592_v24 = vmul.f32 %v3564_v17, %v2580_v14 }
 0xa58   :  { %v2596_v37 = vsub.f32 2.0, %v2592_v24 }
 0xa5a   :  { %v2600_v11 = vmul.f32 %v3564_v17, %v2596_v37 }
 0xa5c   :  { %v2604_v12 = vmul.f32 %v2600_v11, %v2580_v14 }
 0xa5e   :  { %v2608_v13 = vsub.f32 2.0, %v2604_v12 }
 0xa5f   :  { %v2577_v15 = vpop.xlane.xlu1 %2576 }
 0xa60   :  { %v2612_v18 = vmul.f32 %v2608_v13, %v2600_v11  ;;  %3565 = vrcp.f32 %v2577_v15 }
 0xa62   :  { %v2616_v19 = vmul.f32 %v3556_v57, %v2612_v18 }
 0xa63   :  { %v2624_v16 = vpop.permute.xlu1 %2623 }
 0xa64   :  { %v2620_v26 = vadd.f32 %v2616_v19, %v4060_v38  ;;  %3436 = vmatpush3.msra.mxu1 %v2624_v16 }
 0xa65   :  { %3445 = vmatprep.subr.mxu1 %v3694_v10 }
 0xa66   :  { %v3102_v28 = vmul.f32 0.25, %v2620_v26 }
 0xa67   :  { %v2586_v23 = vpop.xlane.xlu0 %2585 }
 0xa68   :  { %3106 = vst.msk [vmem:[#allocation9 + $0x8] sm:$0xff] %vm181_vm2, %v3102_v28  ;;  %3567 = vrcp.f32 %v2586_v23 }
 0xa6a   :  { %v3566_v36 = vpop.eup %3565 }
 0xa6b   :  { %v2591_v20 = vmul.f32 %v3566_v36, %v2577_v15  ;;  %v2700_v9 = vpop.permute.xlu0 %2699 }
 0xa6c   :  { %3441 = vmatpush3.msra.mxu0 %v2700_v9 }
 0xa6d   :  { %v2595_v25 = vsub.f32 2.0, %v2591_v20  ;;  %3443 = vmatmul.mubr.msk.f32.vlgmr.msra.gmra.mrb[32].mxu0 %vm181_vm2, %v2616_v19  ;;  %3450 = vmatprep.subr.mxu0 %v3694_v10 }
 0xa6e   :  { %3452 = vmatprep.mubr.msk.f32.mxu0 %vm3695_vm1, %v3694_v10 }
 0xa6f   :  { %v2599_v38 = vmul.f32 %v3566_v36, %v2595_v25  ;;  %v2932_v37 = vpop.permute.xlu0 %2931 }
 0xa70   :  { %v2975_v16 = vsel %vm181_vm2, %v3931_v45, %v2932_v37 }
 0xa71   :  { %v2603_v27 = vmul.f32 %v2599_v38, %v2577_v15 }
 0xa72   :  { %v3568_v29 = vpop.eup %3567 }
 0xa73   :  { %v2607_v31 = vsub.f32 2.0, %v2603_v27  ;;  %v2594_v32 = vmul.f32 %v3568_v29, %v2586_v23  ;;  %v2948_v12 = vpop.permute.xlu0 %2947 }
 0xa74   :  { %v2980_v28 = vsel %vm2979_vm3, %v2975_v16, %v2948_v12 }
 0xa75   :  { %v2611_v33 = vmul.f32 %v2607_v31, %v2599_v38  ;;  %v2598_v34 = vsub.f32 2.0, %v2594_v32 }
 0xa77   :  { %v2615_v35 = vmul.f32 %v3558_v41, %v2611_v33  ;;  %v2602_v39 = vmul.f32 %v3568_v29, %v2598_v34  ;;  %v3477_v41 = vpack.c.bf16 %v2990_v1, %v2989_v63  ;;  %v2936_v15 = vpop.permute.xlu0 %2935 }
 0xa78   :  { %v2977_v45 = vsel %vm181_vm2, %v3935_v49, %v2936_v15 }
 0xa79   :  { %v2619_v40 = vadd.f32 %v2615_v35, %v4069_v58  ;;  %v2606_v42 = vmul.f32 %v2602_v39, %v2586_v23  ;;  %3438 = vmatmul.mubr.msk.f32.vlgmr.msra.gmra.mrb[28].mxu1 %vm181_vm2, %v2615_v35 }
 0xa7a   :  { %3447 = vmatprep.mubr.msk.f32.mxu1 %vm3695_vm1, %v3694_v10 }
 0xa7b   :  { %v3101_v43 = vmul.f32 0.25, %v2619_v40  ;;  %v2610_v44 = vsub.f32 2.0, %v2606_v42  ;;  %v2952_v19 = vpop.permute.xlu0 %2951 }
 0xa7c   :  { %v2982_v27 = vsel %vm2979_vm3, %v2977_v45, %v2952_v19 }
 0xa7d   :  { %3105 = vst.msk [vmem:[#allocation9] sm:$0xff] %vm181_vm2, %v3101_v43  ;;  %v2614_v30 = vmul.f32 %v2610_v44, %v2602_v39 }
 0xa7f   :  { %v2618_v55 = vmul.f32 %v4117_v3, %v2614_v30  ;;  %v3481_v3 = vpack.c.bf16 %v2992_v0, %v2991_v2 }
 0xa81   :  { %v2622_v46 = vadd.f32 %v2618_v55, %v4078_v50 }
 0xa83   :  { %v3104_v48 = vmul.f32 0.25, %v2622_v46 }
 0xa85   :  { %3108 = vst.msk [vmem:[#allocation9 + $0x18] sm:$0xff] %vm181_vm2, %v3104_v48 }
 0xa94   :  { %v2583_v52 = vpop.xlane.xlu1 %2582 }
 0xa95   :  { %3569 = vrcp.f32 %v2583_v52 }
 0xa98   :  { %v2776_v58 = vpop.permute.xlu1 %2775 }
 0xa99   :  { %3446 = vmatpush3.msra.mxu1 %v2776_v58 }
 0xa9a   :  { %3478 = vmatprep.subr.bf16.mxu1 %v3477_v41 }
 0xa9c   :  { %v2852_v53 = vpop.permute.xlu1 %2851 }
 0xa9d   :  { %3451 = vmatpush3.msra.mxu0 %v2852_v53 }
 0xa9e   :  { %3453 = vmatmul.mubr.msk.f32.vlgmr.msra.gmra.mrb[34].mxu0 %vm181_vm2, %v2618_v55 }
 0xa9f   :  { %v3570_v10 = vpop.eup %3569 }
 0xaa0   :  { %v2593_v54 = vmul.f32 %v3570_v10, %v2583_v52  ;;  %v2934_v24 = vpop.permute.xlu1 %2933 }
 0xaa1   :  { %v2976_v23 = vsel %vm181_vm2, %v3933_v47, %v2934_v24 }
 0xaa2   :  { %v2597_v56 = vsub.f32 2.0, %v2593_v54 }
 0xaa4   :  { %v2601_v57 = vmul.f32 %v3570_v10, %v2597_v56  ;;  %v2950_v11 = vpop.permute.xlu1 %2949 }
 0xaa5   :  { %v2981_v20 = vsel %vm2979_vm3, %v2976_v23, %v2950_v11 }
 0xaa6   :  { %v2605_v59 = vmul.f32 %v2601_v57, %v2583_v52 }
 0xaa8   :  { %v2609_v60 = vsub.f32 2.0, %v2605_v59  ;;  %v2938_v13 = vpop.permute.xlu1 %2937 }
 0xaa9   :  { %v2978_v47 = vsel %vm181_vm2, %v3937_v51, %v2938_v13 }
 0xaaa   :  { %v2613_v61 = vmul.f32 %v2609_v60, %v2601_v57 }
 0xaac   :  { %v2617_v50 = vmul.f32 %v4127_v7, %v2613_v61  ;;  %v2954_v18 = vpop.permute.xlu1 %2953 }
 0xaad   :  { %v2983_v31 = vsel %vm2979_vm3, %v2978_v47, %v2954_v18 }
 0xaae   :  { %v2621_v62 = vadd.f32 %v2617_v50, %v4096_v21  ;;  %3448 = vmatmul.mubr.msk.f32.vlgmr.msra.gmra.mrb[30].mxu1 %vm181_vm2, %v2617_v50 }
 0xaaf   :  { %3480 = vmatpush3.bf16.msra.mxu1 %v3477_v41 }
 0xab0   :  { %v3103_v22 = vmul.f32 0.25, %v2621_v62  ;;  %3482 = vmatprep.subr.bf16.mxu1 %v3481_v3 }
 0xab2   :  { %3107 = vst.msk [vmem:[#allocation9 + $0x10] sm:$0xff] %vm181_vm2, %v3103_v22 }
 0xab3   :  { %3484 = vmatpush3.bf16.msra.mxu1 %v3481_v3 }
 0xb40   :  { %v2771_v4 = vpop.f32.mrb[32].mxu0 }
 0xb41   :  { %2965 = vrot.lane.b32.xlu1 %v2771_v4, %s3708_s22  ;;  %v3444_v5 = vpop.f32.mrb[33].mxu0 }
 0xb4c   :  { %v2695_v21 = vpop.f32.mrb[28].mxu1 }
 0xb4d   :  { %v3439_v6 = vpop.f32.mrb[29].mxu1  ;;  %2963 = vrot.lane.b32.xlu0 %v2695_v21, %s3708_s22 }
 0xb71   :  { %v2923_v7 = vpop.f32.mrb[34].mxu0 }
 0xb72   :  { %2969 = vrot.lane.b32.xlu1 %v2923_v7, %s3708_s22  ;;  %v3454_v8 = vpop.f32.mrb[35].mxu0 }
 0xb81   :  { %v2847_v14 = vpop.f32.mrb[30].mxu1 }
 0xb82   :  { %v3449_v17 = vpop.f32.mrb[31].mxu1  ;;  %2967 = vrot.lane.b32.xlu0 %v2847_v14, %s3708_s22 }
 0xbb3   :  { %v2966_v26 = vpop.permute.xlu1 %2965 }
 0xbb4   :  { %v2986_v25 = vsel %vm2984_vm4, %v2981_v20, %v2966_v26 }
 0xbbf   :  { %v2964_v36 = vpop.permute.xlu0 %2963 }
 0xbc0   :  { %v2985_v9 = vsel %vm2984_vm4, %v2980_v28, %v2964_v36 }
 0xbc1   :  { %3463 = vmatprep.mubr.msk.f32.mxu1 %vm80_vm0, %v2985_v9 }
 0xbc2   :  { %3464 = vmatmul.mubr.msk.f32.vlgmr.msra.gmra.mrb[32].mxu1 %vm80_vm0, %v2986_v25 }
 0xbe4   :  { %v2970_v38 = vpop.permute.xlu1 %2969 }
 0xbe5   :  { %v2988_v33 = vsel %vm2984_vm4, %v2983_v31, %v2970_v38 }
 0xbf4   :  { %v2968_v29 = vpop.permute.xlu0 %2967 }
 0xbf5   :  { %v2987_v32 = vsel %vm2984_vm4, %v2982_v27, %v2968_v29 }
 0xbf6   :  { %3466 = vmatprep.mubr.msk.f32.mxu1 %vm80_vm0, %v2987_v32 }
 0xbf7   :  { %3467 = vmatmul.mubr.msk.f32.gmra.mrb[34].mxu1 %vm80_vm0, %v2988_v33 }
 0xbf8   :  { %3648 = shalt.err (!%p3645_p0)
}
 0xbf9   :  { %s3649_s29 = scalar_lea.hbm %s4220_s6, 512 }
 0xbfa   :  { %p3650_p1 = scmp.ne.s32.totalorder %s4220_s6, %s3649_s29  ;;  %p3653_p2 = scmp.lt.u32.totalorder %s3649_s29, %s4220_s6 }
 0xbfc   :  { %p3655_p3 = pnand %p3653_p2, %p3650_p1 }
 0xbfe   :  { %3658 = shalt.err (!%p3655_p3)
}
 0xbff   :  { %3132 = dma.vmem_to_hbm [thread:$0]  %s3127_s25, 512, %s4220_s6, [#allocation10], %s3691_s9, %s3691_s9, %s3692_s10  }
 0xc00   :  { %v3196_v49 = vld [vmem:[%s4218_s4] ss:$0 sm:$0xff]  ;;  %s3710_s2 = smov [#allocation8]  }
 0xc01   :  { %s3114_s13 = sshll.u32 %s3710_s2, 4  ;;  %s3115_s13 = int_to_ptr.vmem [resolvable:$true] %s3114_s13 }
 0xc02   :  { %s3659_s4 = scalar_lea.vmem %s3115_s13, 512  ;;  %p3664_p5 = scmp.lt.s32.totalorder %s3115_s13, %s3115_s13 }
 0xc03   :  { %p3660_p4 = scmp.ne.s32.totalorder %s3115_s13, %s3659_s4  ;;  %p3665_p6 = scmp.lt.s32.totalorder %s3659_s4, %s3659_s4 }
 0xc05   :  { %p3666_p7 = por %p3665_p6, %p3664_p5 }
 0xc07   :  { %p3667_p8 = pnand %p3666_p7, %p3660_p4 }
 0xc95   :  { %v3465_v51 = vpop.f32.mrb[32].mxu1 }
 0xc96   :  { %v3084_v34 = vadd.f32 %v3465_v51, %v3196_v49  ;;  %v3078_v35 = vpop.f32.mrb[33].mxu1 }
 0xc97   :  { %v3079_v39 = vadd.f32 %v3196_v49, %v3078_v35 }
 0xc98   :  { %3098 = vst.msk [vmem:[#allocation8 + $0x8] sm:$0xff] %vm80_vm0, %v3084_v34 }
 0xc99   :  { %3097 = vst.msk [vmem:[#allocation8] sm:$0xff] %vm80_vm0, %v3079_v39 }
 0xcca   :  { %v3468_v40 = vpop.f32.mrb[34].mxu1 }
 0xccb   :  { %v3094_v42 = vadd.f32 %v3468_v40, %v3196_v49  ;;  %v3088_v43 = vpop.f32.mrb[35].mxu1 }
 0xccc   :  { %v3089_v44 = vadd.f32 %v3196_v49, %v3088_v43 }
 0xccd   :  { %3100 = vst.msk [vmem:[#allocation8 + $0x18] sm:$0xff] %vm80_vm0, %v3094_v42 }
 0xcce   :  { %3099 = vst.msk [vmem:[#allocation8 + $0x10] sm:$0xff] %vm80_vm0, %v3089_v44 }
 0xccf   :  { %3670 = shalt.err (!%p3667_p8)
}
 0xcd0   :  { %s3671_s15 = scalar_lea.hbm %s4219_s5, 512 }
 0xcd1   :  { %p3672_p9 = scmp.ne.s32.totalorder %s4219_s5, %s3671_s15  ;;  %p3675_p10 = scmp.lt.u32.totalorder %s3671_s15, %s4219_s5 }
 0xcd3   :  { %p3677_p11 = pnand %p3675_p10, %p3672_p9 }
 0xcd5   :  { %3680 = shalt.err (!%p3677_p11)
}
 0xcd6   :  { %3120 = dma.vmem_to_hbm [thread:$0]  %s3115_s13, 512, %s4219_s5, [#allocation4], %s3691_s9, %s3691_s9, %s3692_s10  }
 0xcd7   :  { %3685 = dma.done.wait [#allocation4], 512  }
 0xcd8   :  { %3686 = vsyncadd [#allocation4], 4294966784 }
 0xcd9   :  { %3687 = dma.done.wait [#allocation10], 512  }
 0xcda   :  { %3688 = vsyncadd [#allocation10], 4294966784 }
 0xcdb   :  { %3139 = vsyncpa [#allocation3], 1 }
 0xcdc   :  { %3140 = vsyncpa [#allocation6], 1 }
 0xcdd   :  { %3141 = vsyncpa [#allocation4], 1 }
 0xcde   :  { %3142 = vsyncpa [#allocation10], 1 }

</bundles_post_ra>
